<compile_context>
chip_gen: v5e
topology: v5e:2x2
jax: 0.10.0
libtpu: 0.0.40
codegen_flags: <defaults>
</compile_context>

<pallas_src>
import jax
import jax.numpy as jnp
import numpy as np
from jax import lax
from jax.experimental import pallas as pl
from jax.experimental.pallas import tpu as pltpu


def _make_lstm_kernel(T, H, unroll):
    """Builds the single-invocation LSTM kernel for fixed T, H."""

    def kernel(x_ref,        # (T, Bb, 1)  f32   input sequence (one batch chunk)
               wih_ref,      # (4, 1, H)   f32   per-gate input weights (IN == 1)
               whh_ref,      # (4, H, H)   bf16  per-gate recurrent weights W_hh_g^T
               b_ref,        # (4, 1, H)   f32   per-gate fused bias (b_ih + b_hh)
               fcw_ref,      # (1, H)      f32   fc weight row
               fcb_ref,      # (1, 1)      f32   fc bias
               pred_ref,     # (Bb, 1)     f32   out: prediction
               hn_ref,       # (Bb, H)     f32   out: final hidden state
               cn_ref,       # (Bb, H)     f32   out: final cell state
               xpi_ref, xpf_ref, xpg_ref, xpo_ref):   # (T, Bb, H) f32 scratch
        Bb = hn_ref.shape[0]

        # ---- Phase 1: hoist the input projection out of the recurrence -----
        # IN == 1, so x @ W_ih^T is just a lane-broadcast multiply on the VPU;
        # the fused bias is added here once instead of every time step.
        x = x_ref[...]                                          # (T, Bb, 1)
        xpi_ref[...] = x * wih_ref[0][None] + b_ref[0][None]
        xpf_ref[...] = x * wih_ref[1][None] + b_ref[1][None]
        xpg_ref[...] = x * wih_ref[2][None] + b_ref[2][None]
        xpo_ref[...] = x * wih_ref[3][None] + b_ref[3][None]

        # recurrent weights: load once, keep in vregs across the whole loop
        w_i = whh_ref[0]
        w_f = whh_ref[1]
        w_g = whh_ref[2]
        w_o = whh_ref[3]
        mxu_dtype = whh_ref.dtype

        # ---- Phase 2: serial recurrence over time ---------------------------
        def step(t, carry):
            h, c = carry                                        # (Bb, H) f32
            hb = h.astype(mxu_dtype)                            # bf16 MXU operand
            a_i = xpi_ref[t] + jnp.dot(hb, w_i, preferred_element_type=jnp.float32)
            a_f = xpf_ref[t] + jnp.dot(hb, w_f, preferred_element_type=jnp.float32)
            a_g = xpg_ref[t] + jnp.dot(hb, w_g, preferred_element_type=jnp.float32)
            a_o = xpo_ref[t] + jnp.dot(hb, w_o, preferred_element_type=jnp.float32)
            # gate math stays f32 (EUP/VPU); PyTorch gate order i, f, g, o
            i_g = jax.nn.sigmoid(a_i)
            f_g = jax.nn.sigmoid(a_f)
            g_g = jnp.tanh(a_g)
            o_g = jax.nn.sigmoid(a_o)
            c_new = f_g * c + i_g * g_g
            h_new = o_g * jnp.tanh(c_new)
            return (h_new, c_new)

        h0 = jnp.zeros((Bb, H), jnp.float32)
        c0 = jnp.zeros((Bb, H), jnp.float32)
        h_n, c_n = lax.fori_loop(0, T, step, (h0, c0), unroll=unroll)

        hn_ref[...] = h_n
        cn_ref[...] = c_n
        # fc head: (B,H)@(H,1) is an N=1 matmul -> VPU multiply + lane reduce
        # instead of a degenerate MXU push.
        pred_ref[...] = (jnp.sum(h_n * fcw_ref[...], axis=-1, keepdims=True)
                         + fcb_ref[...])

    return kernel


def lstm_forward(x_btI, params, *, recurrent_matmul_dtype=jnp.bfloat16):
    """x_btI: (B, T, 1) float32, batch_first like PyTorch.

    Returns (prediction (B, 1), (h_n (1, B, H), c_n (1, B, H))).
    """
    w_ih, w_hh, b_ih, b_hh, fc_w, fc_b = params
    B, T, IN = x_btI.shape
    assert IN == 1, "module is defined with input_size=1"
    H = w_hh.shape[1]

    # --- batch padding / chunking -------------------------------------------
    # pad to a multiple of 8 sublanes; chunk in 128-row blocks over a
    # "parallel" grid axis when large (v7x megacore, MXU row utilisation).
    B_pad = max(8, -(-B // 8) * 8)
    if B_pad > 128:
        B_pad = -(-B_pad // 128) * 128
        batch_block = 128
    else:
        batch_block = B_pad
    nb = B_pad // batch_block

    # --- host-side weight / input preprocessing ------------------------------
    x_tb1 = jnp.transpose(x_btI, (1, 0, 2))                       # (T, B, 1)
    x_tb1 = jnp.pad(x_tb1, ((0, 0), (0, B_pad - B), (0, 0)))       # (T, B_pad, 1)

    # split per gate (PyTorch order i, f, g, o); pre-transpose W_hh so the
    # kernel does h @ W_hh_g^T with plain row-major matmuls.
    wih4 = w_ih.reshape(4, 1, H).astype(jnp.float32)               # (4, 1, H), IN==1
    whh4 = jnp.transpose(w_hh.reshape(4, H, H), (0, 2, 1))         # (4, H, H) = W_hh_g^T
    whh4 = whh4.astype(recurrent_matmul_dtype)                     # bf16 for the MXU
    b4 = (b_ih + b_hh).reshape(4, 1, H).astype(jnp.float32)        # fused bias
    fcw = fc_w.reshape(1, H).astype(jnp.float32)
    fcb = fc_b.reshape(1, 1).astype(jnp.float32)

    kernel = _make_lstm_kernel(T, H, unroll=True if T <= 64 else 8)

    out_shapes = (
        jax.ShapeDtypeStruct((B_pad, 1), jnp.float32),   # prediction
        jax.ShapeDtypeStruct((B_pad, H), jnp.float32),   # h_n
        jax.ShapeDtypeStruct((B_pad, H), jnp.float32),   # c_n
    )

    pred, h_n, c_n = pl.pallas_call(
        kernel,
        out_shape=out_shapes,
        grid_spec=pltpu.PrefetchScalarGridSpec(
            num_scalar_prefetch=0,
            grid=(nb,),                      # batch chunks only; time is in-kernel
            in_specs=[
                pl.BlockSpec((T, batch_block, 1), lambda b: (0, b, 0)),   # x
                pl.BlockSpec((4, 1, H), lambda b: (0, 0, 0)),             # W_ih per gate
                pl.BlockSpec((4, H, H), lambda b: (0, 0, 0)),             # W_hh^T per gate
                pl.BlockSpec((4, 1, H), lambda b: (0, 0, 0)),             # bias per gate
                pl.BlockSpec((1, H), lambda b: (0, 0)),                   # fc weight
                pl.BlockSpec((1, 1), lambda b: (0, 0)),                   # fc bias
            ],
            out_specs=[
                pl.BlockSpec((batch_block, 1), lambda b: (b, 0)),
                pl.BlockSpec((batch_block, H), lambda b: (b, 0)),
                pl.BlockSpec((batch_block, H), lambda b: (b, 0)),
            ],
            scratch_shapes=[pltpu.VMEM((T, batch_block, H), jnp.float32)
                            for _ in range(4)],          # hoisted xproj, per gate
        ),
        compiler_params=pltpu.CompilerParams(
            # batch chunks are independent -> shard across TensorCores on v7x
            dimension_semantics=("parallel",)),
    )(x_tb1, wih4, whh4, b4, fcw, fcb)

    return pred[:B], (h_n[:B][None], c_n[:B][None])


def lstm_forward_ref(x_btI, params):
    """Pure-JAX reference (matches PyTorch nn.LSTM + Linear semantics)."""
    w_ih, w_hh, b_ih, b_hh, fc_w, fc_b = params
    B, T, IN = x_btI.shape
    H = w_hh.shape[1]
    h0 = jnp.zeros((B, H), jnp.float32)
    c0 = jnp.zeros((B, H), jnp.float32)

    def step(carry, x_t):
        h, c = carry
        gates = x_t @ w_ih.T + h @ w_hh.T + b_ih + b_hh
        i = jax.nn.sigmoid(gates[:, 0:H])
        f = jax.nn.sigmoid(gates[:, H:2 * H])
        g = jnp.tanh(gates[:, 2 * H:3 * H])
        o = jax.nn.sigmoid(gates[:, 3 * H:4 * H])
        c_new = f * c + i * g
        h_new = o * jnp.tanh(c_new)
        return (h_new, c_new), h_new

    (h_n, c_n), _ = lax.scan(step, (h0, c0), jnp.transpose(x_btI, (1, 0, 2)))
    pred = h_n @ fc_w.T + fc_b
    return pred, (h_n[None], c_n[None])


def init_params(key, hidden_size, input_size=1, output_size=1):
    # Deterministic init mimicking PyTorch's U(-1/sqrt(H), 1/sqrt(H)).
    H = hidden_size
    k = 1.0 / np.sqrt(H)
    keys = jax.random.split(key, 6)
    w_ih = jax.random.uniform(keys[0], (4 * H, input_size), jnp.float32, -k, k)
    w_hh = jax.random.uniform(keys[1], (4 * H, H), jnp.float32, -k, k)
    b_ih = jax.random.uniform(keys[2], (4 * H,), jnp.float32, -k, k)
    b_hh = jax.random.uniform(keys[3], (4 * H,), jnp.float32, -k, k)
    fc_w = jax.random.uniform(keys[4], (output_size, H), jnp.float32, -k, k)
    fc_b = jax.random.uniform(keys[5], (output_size,), jnp.float32, -k, k)
    return (w_ih, w_hh, b_ih, b_hh, fc_w, fc_b)


if __name__ == "__main__":
    B, T, IN, H = 2, 8, 1, 32
    key = jax.random.PRNGKey(0)
    kx, kp = jax.random.split(key)
    x = jax.random.normal(kx, (B, T, IN), jnp.float32)   # batch_first input
    params = init_params(kp, H)

    pred_r, (h_r, c_r) = lstm_forward_ref(x, params)

    # exact path (f32 recurrent matmul) -- tight check vs pure-JAX reference
    pred32, (h32, c32) = lstm_forward(x, params,
                                      recurrent_matmul_dtype=jnp.float32)
    jax.block_until_ready((pred32, h32, c32))
    np.testing.assert_allclose(np.asarray(pred32), np.asarray(pred_r), atol=1e-4, rtol=1e-4)
    np.testing.assert_allclose(np.asarray(h32), np.asarray(h_r), atol=1e-4, rtol=1e-4)
    np.testing.assert_allclose(np.asarray(c32), np.asarray(c_r), atol=1e-4, rtol=1e-4)

    # default fast path (bf16 recurrent weights on the MXU) -- looser tolerance
    pred, (h_n, c_n) = lstm_forward(x, params)
    jax.block_until_ready((pred, h_n, c_n))
    np.testing.assert_allclose(np.asarray(pred), np.asarray(pred_r), atol=2e-2, rtol=2e-2)
    np.testing.assert_allclose(np.asarray(h_n), np.asarray(h_r), atol=2e-2, rtol=2e-2)
    np.testing.assert_allclose(np.asarray(c_n), np.asarray(c_r), atol=2e-2, rtol=2e-2)

    print("KERNEL_OK")
</pallas_src>

<mosaic_0001>
module attributes {stable_mosaic.version = 11 : i64} {
  func.func @kernel(%arg0: i32, %arg1: memref<8x8x1xf32, #tpu.memory_space<vmem>>, %arg2: memref<4x1x32xf32, #tpu.memory_space<vmem>>, %arg3: memref<4x32x32xf32, #tpu.memory_space<vmem>>, %arg4: memref<4x1x32xf32, #tpu.memory_space<vmem>>, %arg5: memref<1x32xf32, #tpu.memory_space<vmem>>, %arg6: memref<1x1xf32, #tpu.memory_space<vmem>>, %arg7: memref<8x1xf32, #tpu.memory_space<vmem>>, %arg8: memref<8x32xf32, #tpu.memory_space<vmem>>, %arg9: memref<8x32xf32, #tpu.memory_space<vmem>>, %arg10: memref<8x8x32xf32, #tpu.memory_space<vmem>>, %arg11: memref<8x8x32xf32, #tpu.memory_space<vmem>>, %arg12: memref<8x8x32xf32, #tpu.memory_space<vmem>>, %arg13: memref<8x8x32xf32, #tpu.memory_space<vmem>>) attributes {dimension_semantics = [#tpu.dimension_semantics<parallel>], iteration_bounds = array<i64: 1>, scalar_prefetch = 0 : i64, scratch_operands = 4 : i64, tpu.core_type = #tpu.core_type<tc>, window_params = [{transform_indices = @transform_0, window_bounds = array<i64: 8, 8, 1>}, {pipeline_mode = #tpu.pipeline_mode<synchronous>, transform_indices = @transform_1, window_bounds = array<i64: 4, 1, 32>}, {pipeline_mode = #tpu.pipeline_mode<synchronous>, transform_indices = @transform_2, window_bounds = array<i64: 4, 32, 32>}, {pipeline_mode = #tpu.pipeline_mode<synchronous>, transform_indices = @transform_3, window_bounds = array<i64: 4, 1, 32>}, {pipeline_mode = #tpu.pipeline_mode<synchronous>, transform_indices = @transform_4, window_bounds = array<i64: 1, 32>}, {pipeline_mode = #tpu.pipeline_mode<synchronous>, transform_indices = @transform_5, window_bounds = array<i64: 1, 1>}, {transform_indices = @transform_6, window_bounds = array<i64: 8, 1>}, {transform_indices = @transform_7, window_bounds = array<i64: 8, 32>}, {transform_indices = @transform_8, window_bounds = array<i64: 8, 32>}]} {
    %c0 = arith.constant 0 : index
    %c0_0 = arith.constant 0 : index
    %c0_1 = arith.constant 0 : index
    %0 = vector.load %arg1[%c0, %c0_0, %c0_1] : memref<8x8x1xf32, #tpu.memory_space<vmem>>, vector<8x8x1xf32>
    %c0_2 = arith.constant 0 : index
    %c0_3 = arith.constant 0 : index
    %c0_4 = arith.constant 0 : index
    %1 = vector.load %arg2[%c0_2, %c0_3, %c0_4] : memref<4x1x32xf32, #tpu.memory_space<vmem>>, vector<1x1x32xf32>
    %2 = vector.shape_cast %1 : vector<1x1x32xf32> to vector<1x32xf32>
    %3 = vector.shape_cast %2 : vector<1x32xf32> to vector<1x1x32xf32>
    %4 = vector.broadcast %0 : vector<8x8x1xf32> to vector<8x8x32xf32>
    %5 = vector.broadcast %3 : vector<1x1x32xf32> to vector<8x8x32xf32>
    %6 = arith.mulf %4, %5 : vector<8x8x32xf32>
    %c0_5 = arith.constant 0 : index
    %c0_6 = arith.constant 0 : index
    %c0_7 = arith.constant 0 : index
    %7 = vector.load %arg4[%c0_5, %c0_6, %c0_7] : memref<4x1x32xf32, #tpu.memory_space<vmem>>, vector<1x1x32xf32>
    %8 = vector.shape_cast %7 : vector<1x1x32xf32> to vector<1x32xf32>
    %9 = vector.shape_cast %8 : vector<1x32xf32> to vector<1x1x32xf32>
    %10 = vector.broadcast %9 : vector<1x1x32xf32> to vector<8x8x32xf32>
    %11 = arith.addf %6, %10 : vector<8x8x32xf32>
    %c0_8 = arith.constant 0 : index
    %c0_9 = arith.constant 0 : index
    %c0_10 = arith.constant 0 : index
    %12 = vector.load %arg10[%c0_8, %c0_9, %c0_10] : memref<8x8x32xf32, #tpu.memory_space<vmem>>, vector<8x8x32xf32>
    tpu.vector_store %arg10[%c0_8, %c0_9, %c0_10], %11 {strides = array<i32>} : memref<8x8x32xf32, #tpu.memory_space<vmem>>, vector<8x8x32xf32>,
    %c1 = arith.constant 1 : index
    %c0_11 = arith.constant 0 : index
    %c0_12 = arith.constant 0 : index
    %13 = vector.load %arg2[%c1, %c0_11, %c0_12] : memref<4x1x32xf32, #tpu.memory_space<vmem>>, vector<1x1x32xf32>
    %14 = vector.shape_cast %13 : vector<1x1x32xf32> to vector<1x32xf32>
    %15 = vector.shape_cast %14 : vector<1x32xf32> to vector<1x1x32xf32>
    %16 = vector.broadcast %0 : vector<8x8x1xf32> to vector<8x8x32xf32>
    %17 = vector.broadcast %15 : vector<1x1x32xf32> to vector<8x8x32xf32>
    %18 = arith.mulf %16, %17 : vector<8x8x32xf32>
    %c1_13 = arith.constant 1 : index
    %c0_14 = arith.constant 0 : index
    %c0_15 = arith.constant 0 : index
    %19 = vector.load %arg4[%c1_13, %c0_14, %c0_15] : memref<4x1x32xf32, #tpu.memory_space<vmem>>, vector<1x1x32xf32>
    %20 = vector.shape_cast %19 : vector<1x1x32xf32> to vector<1x32xf32>
    %21 = vector.shape_cast %20 : vector<1x32xf32> to vector<1x1x32xf32>
    %22 = vector.broadcast %21 : vector<1x1x32xf32> to vector<8x8x32xf32>
    %23 = arith.addf %18, %22 : vector<8x8x32xf32>
    %c0_16 = arith.constant 0 : index
    %c0_17 = arith.constant 0 : index
    %c0_18 = arith.constant 0 : index
    %24 = vector.load %arg11[%c0_16, %c0_17, %c0_18] : memref<8x8x32xf32, #tpu.memory_space<vmem>>, vector<8x8x32xf32>
    tpu.vector_store %arg11[%c0_16, %c0_17, %c0_18], %23 {strides = array<i32>} : memref<8x8x32xf32, #tpu.memory_space<vmem>>, vector<8x8x32xf32>,
    %c2 = arith.constant 2 : index
    %c0_19 = arith.constant 0 : index
    %c0_20 = arith.constant 0 : index
    %25 = vector.load %arg2[%c2, %c0_19, %c0_20] : memref<4x1x32xf32, #tpu.memory_space<vmem>>, vector<1x1x32xf32>
    %26 = vector.shape_cast %25 : vector<1x1x32xf32> to vector<1x32xf32>
    %27 = vector.shape_cast %26 : vector<1x32xf32> to vector<1x1x32xf32>
    %28 = vector.broadcast %0 : vector<8x8x1xf32> to vector<8x8x32xf32>
    %29 = vector.broadcast %27 : vector<1x1x32xf32> to vector<8x8x32xf32>
    %30 = arith.mulf %28, %29 : vector<8x8x32xf32>
    %c2_21 = arith.constant 2 : index
    %c0_22 = arith.constant 0 : index
    %c0_23 = arith.constant 0 : index
    %31 = vector.load %arg4[%c2_21, %c0_22, %c0_23] : memref<4x1x32xf32, #tpu.memory_space<vmem>>, vector<1x1x32xf32>
    %32 = vector.shape_cast %31 : vector<1x1x32xf32> to vector<1x32xf32>
    %33 = vector.shape_cast %32 : vector<1x32xf32> to vector<1x1x32xf32>
    %34 = vector.broadcast %33 : vector<1x1x32xf32> to vector<8x8x32xf32>
    %35 = arith.addf %30, %34 : vector<8x8x32xf32>
    %c0_24 = arith.constant 0 : index
    %c0_25 = arith.constant 0 : index
    %c0_26 = arith.constant 0 : index
    %36 = vector.load %arg12[%c0_24, %c0_25, %c0_26] : memref<8x8x32xf32, #tpu.memory_space<vmem>>, vector<8x8x32xf32>
    tpu.vector_store %arg12[%c0_24, %c0_25, %c0_26], %35 {strides = array<i32>} : memref<8x8x32xf32, #tpu.memory_space<vmem>>, vector<8x8x32xf32>,
    %c3 = arith.constant 3 : index
    %c0_27 = arith.constant 0 : index
    %c0_28 = arith.constant 0 : index
    %37 = vector.load %arg2[%c3, %c0_27, %c0_28] : memref<4x1x32xf32, #tpu.memory_space<vmem>>, vector<1x1x32xf32>
    %38 = vector.shape_cast %37 : vector<1x1x32xf32> to vector<1x32xf32>
    %39 = vector.shape_cast %38 : vector<1x32xf32> to vector<1x1x32xf32>
    %40 = vector.broadcast %0 : vector<8x8x1xf32> to vector<8x8x32xf32>
    %41 = vector.broadcast %39 : vector<1x1x32xf32> to vector<8x8x32xf32>
    %42 = arith.mulf %40, %41 : vector<8x8x32xf32>
    %c3_29 = arith.constant 3 : index
    %c0_30 = arith.constant 0 : index
    %c0_31 = arith.constant 0 : index
    %43 = vector.load %arg4[%c3_29, %c0_30, %c0_31] : memref<4x1x32xf32, #tpu.memory_space<vmem>>, vector<1x1x32xf32>
    %44 = vector.shape_cast %43 : vector<1x1x32xf32> to vector<1x32xf32>
    %45 = vector.shape_cast %44 : vector<1x32xf32> to vector<1x1x32xf32>
    %46 = vector.broadcast %45 : vector<1x1x32xf32> to vector<8x8x32xf32>
    %47 = arith.addf %42, %46 : vector<8x8x32xf32>
    %c0_32 = arith.constant 0 : index
    %c0_33 = arith.constant 0 : index
    %c0_34 = arith.constant 0 : index
    %48 = vector.load %arg13[%c0_32, %c0_33, %c0_34] : memref<8x8x32xf32, #tpu.memory_space<vmem>>, vector<8x8x32xf32>
    tpu.vector_store %arg13[%c0_32, %c0_33, %c0_34], %47 {strides = array<i32>} : memref<8x8x32xf32, #tpu.memory_space<vmem>>, vector<8x8x32xf32>,
    %c0_35 = arith.constant 0 : index
    %c0_36 = arith.constant 0 : index
    %c0_37 = arith.constant 0 : index
    %49 = vector.load %arg3[%c0_35, %c0_36, %c0_37] : memref<4x32x32xf32, #tpu.memory_space<vmem>>, vector<1x32x32xf32>
    %50 = vector.shape_cast %49 : vector<1x32x32xf32> to vector<32x32xf32>
    %c1_38 = arith.constant 1 : index
    %c0_39 = arith.constant 0 : index
    %c0_40 = arith.constant 0 : index
    %51 = vector.load %arg3[%c1_38, %c0_39, %c0_40] : memref<4x32x32xf32, #tpu.memory_space<vmem>>, vector<1x32x32xf32>
    %52 = vector.shape_cast %51 : vector<1x32x32xf32> to vector<32x32xf32>
    %c2_41 = arith.constant 2 : index
    %c0_42 = arith.constant 0 : index
    %c0_43 = arith.constant 0 : index
    %53 = vector.load %arg3[%c2_41, %c0_42, %c0_43] : memref<4x32x32xf32, #tpu.memory_space<vmem>>, vector<1x32x32xf32>
    %54 = vector.shape_cast %53 : vector<1x32x32xf32> to vector<32x32xf32>
    %c3_44 = arith.constant 3 : index
    %c0_45 = arith.constant 0 : index
    %c0_46 = arith.constant 0 : index
    %55 = vector.load %arg3[%c3_44, %c0_45, %c0_46] : memref<4x32x32xf32, #tpu.memory_space<vmem>>, vector<1x32x32xf32>
    %56 = vector.shape_cast %55 : vector<1x32x32xf32> to vector<32x32xf32>
    %cst = arith.constant 0.000000e+00 : f32
    %57 = vector.broadcast %cst : f32 to vector<8x32xf32>
    %cst_47 = arith.constant 0.000000e+00 : f32
    %58 = vector.broadcast %cst_47 : f32 to vector<8x32xf32>
    %c0_i32 = arith.constant 0 : i32
    %59 = arith.index_cast %c0_i32 : i32 to index
    %c0_48 = arith.constant 0 : index
    %c0_49 = arith.constant 0 : index
    %60 = vector.load %arg10[%59, %c0_48, %c0_49] : memref<8x8x32xf32, #tpu.memory_space<vmem>>, vector<1x8x32xf32>
    %61 = vector.shape_cast %60 : vector<1x8x32xf32> to vector<8x32xf32>
    %cst_50 = arith.constant dense<0.000000e+00> : vector<8x32xf32>
    %62 = tpu.matmul %57, %50, %cst_50 {dimension_numbers = #tpu.dot_dimension_numbers<[1], [0], [0], [1], [0, 0, 1, 1], [], []>} : vector<8x32xf32>, vector<32x32xf32>, vector<8x32xf32> -> vector<8x32xf32>
    %63 = arith.addf %61, %62 : vector<8x32xf32>
    %64 = arith.index_cast %c0_i32 : i32 to index
    %c0_51 = arith.constant 0 : index
    %c0_52 = arith.constant 0 : index
    %65 = vector.load %arg11[%64, %c0_51, %c0_52] : memref<8x8x32xf32, #tpu.memory_space<vmem>>, vector<1x8x32xf32>
    %66 = vector.shape_cast %65 : vector<1x8x32xf32> to vector<8x32xf32>
    %cst_53 = arith.constant dense<0.000000e+00> : vector<8x32xf32>
    %67 = tpu.matmul %57, %52, %cst_53 {dimension_numbers = #tpu.dot_dimension_numbers<[1], [0], [0], [1], [0, 0, 1, 1], [], []>} : vector<8x32xf32>, vector<32x32xf32>, vector<8x32xf32> -> vector<8x32xf32>
    %68 = arith.addf %66, %67 : vector<8x32xf32>
    %69 = arith.index_cast %c0_i32 : i32 to index
    %c0_54 = arith.constant 0 : index
    %c0_55 = arith.constant 0 : index
    %70 = vector.load %arg12[%69, %c0_54, %c0_55] : memref<8x8x32xf32, #tpu.memory_space<vmem>>, vector<1x8x32xf32>
    %71 = vector.shape_cast %70 : vector<1x8x32xf32> to vector<8x32xf32>
    %cst_56 = arith.constant dense<0.000000e+00> : vector<8x32xf32>
    %72 = tpu.matmul %57, %54, %cst_56 {dimension_numbers = #tpu.dot_dimension_numbers<[1], [0], [0], [1], [0, 0, 1, 1], [], []>} : vector<8x32xf32>, vector<32x32xf32>, vector<8x32xf32> -> vector<8x32xf32>
    %73 = arith.addf %71, %72 : vector<8x32xf32>
    %74 = arith.index_cast %c0_i32 : i32 to index
    %c0_57 = arith.constant 0 : index
    %c0_58 = arith.constant 0 : index
    %75 = vector.load %arg13[%74, %c0_57, %c0_58] : memref<8x8x32xf32, #tpu.memory_space<vmem>>, vector<1x8x32xf32>
    %76 = vector.shape_cast %75 : vector<1x8x32xf32> to vector<8x32xf32>
    %cst_59 = arith.constant dense<0.000000e+00> : vector<8x32xf32>
    %77 = tpu.matmul %57, %56, %cst_59 {dimension_numbers = #tpu.dot_dimension_numbers<[1], [0], [0], [1], [0, 0, 1, 1], [], []>} : vector<8x32xf32>, vector<32x32xf32>, vector<8x32xf32> -> vector<8x32xf32>
    %78 = arith.addf %76, %77 : vector<8x32xf32>
    %79 = arith.negf %63 : vector<8x32xf32>
    %80 = math.exp %79 : vector<8x32xf32>
    %cst_60 = arith.constant 1.000000e+00 : f32
    %81 = vector.broadcast %cst_60 : f32 to vector<8x32xf32>
    %82 = arith.addf %81, %80 : vector<8x32xf32>
    %83 = arith.divf %81, %82 : vector<8x32xf32>
    %84 = arith.negf %68 : vector<8x32xf32>
    %85 = math.exp %84 : vector<8x32xf32>
    %cst_61 = arith.constant 1.000000e+00 : f32
    %86 = vector.broadcast %cst_61 : f32 to vector<8x32xf32>
    %87 = arith.addf %86, %85 : vector<8x32xf32>
    %88 = arith.divf %86, %87 : vector<8x32xf32>
    %89 = math.tanh %73 : vector<8x32xf32>
    %90 = arith.negf %78 : vector<8x32xf32>
    %91 = math.exp %90 : vector<8x32xf32>
    %cst_62 = arith.constant 1.000000e+00 : f32
    %92 = vector.broadcast %cst_62 : f32 to vector<8x32xf32>
    %93 = arith.addf %92, %91 : vector<8x32xf32>
    %94 = arith.divf %92, %93 : vector<8x32xf32>
    %95 = arith.mulf %88, %58 : vector<8x32xf32>
    %96 = arith.mulf %83, %89 : vector<8x32xf32>
    %97 = arith.addf %95, %96 : vector<8x32xf32>
    %98 = math.tanh %97 : vector<8x32xf32>
    %99 = arith.mulf %94, %98 : vector<8x32xf32>
    %c1_i32 = arith.constant 1 : i32
    %100 = arith.index_cast %c1_i32 : i32 to index
    %c0_63 = arith.constant 0 : index
    %c0_64 = arith.constant 0 : index
    %101 = vector.load %arg10[%100, %c0_63, %c0_64] : memref<8x8x32xf32, #tpu.memory_space<vmem>>, vector<1x8x32xf32>
    %102 = vector.shape_cast %101 : vector<1x8x32xf32> to vector<8x32xf32>
    %cst_65 = arith.constant dense<0.000000e+00> : vector<8x32xf32>
    %103 = tpu.matmul %99, %50, %cst_65 {dimension_numbers = #tpu.dot_dimension_numbers<[1], [0], [0], [1], [0, 0, 1, 1], [], []>} : vector<8x32xf32>, vector<32x32xf32>, vector<8x32xf32> -> vector<8x32xf32>
    %104 = arith.addf %102, %103 : vector<8x32xf32>
    %105 = arith.index_cast %c1_i32 : i32 to index
    %c0_66 = arith.constant 0 : index
    %c0_67 = arith.constant 0 : index
    %106 = vector.load %arg11[%105, %c0_66, %c0_67] : memref<8x8x32xf32, #tpu.memory_space<vmem>>, vector<1x8x32xf32>
    %107 = vector.shape_cast %106 : vector<1x8x32xf32> to vector<8x32xf32>
    %cst_68 = arith.constant dense<0.000000e+00> : vector<8x32xf32>
    %108 = tpu.matmul %99, %52, %cst_68 {dimension_numbers = #tpu.dot_dimension_numbers<[1], [0], [0], [1], [0, 0, 1, 1], [], []>} : vector<8x32xf32>, vector<32x32xf32>, vector<8x32xf32> -> vector<8x32xf32>
    %109 = arith.addf %107, %108 : vector<8x32xf32>
    %110 = arith.index_cast %c1_i32 : i32 to index
    %c0_69 = arith.constant 0 : index
    %c0_70 = arith.constant 0 : index
    %111 = vector.load %arg12[%110, %c0_69, %c0_70] : memref<8x8x32xf32, #tpu.memory_space<vmem>>, vector<1x8x32xf32>
    %112 = vector.shape_cast %111 : vector<1x8x32xf32> to vector<8x32xf32>
    %cst_71 = arith.constant dense<0.000000e+00> : vector<8x32xf32>
    %113 = tpu.matmul %99, %54, %cst_71 {dimension_numbers = #tpu.dot_dimension_numbers<[1], [0], [0], [1], [0, 0, 1, 1], [], []>} : vector<8x32xf32>, vector<32x32xf32>, vector<8x32xf32> -> vector<8x32xf32>
    %114 = arith.addf %112, %113 : vector<8x32xf32>
    %115 = arith.index_cast %c1_i32 : i32 to index
    %c0_72 = arith.constant 0 : index
    %c0_73 = arith.constant 0 : index
    %116 = vector.load %arg13[%115, %c0_72, %c0_73] : memref<8x8x32xf32, #tpu.memory_space<vmem>>, vector<1x8x32xf32>
    %117 = vector.shape_cast %116 : vector<1x8x32xf32> to vector<8x32xf32>
    %cst_74 = arith.constant dense<0.000000e+00> : vector<8x32xf32>
    %118 = tpu.matmul %99, %56, %cst_74 {dimension_numbers = #tpu.dot_dimension_numbers<[1], [0], [0], [1], [0, 0, 1, 1], [], []>} : vector<8x32xf32>, vector<32x32xf32>, vector<8x32xf32> -> vector<8x32xf32>
    %119 = arith.addf %117, %118 : vector<8x32xf32>
    %120 = arith.negf %104 : vector<8x32xf32>
    %121 = math.exp %120 : vector<8x32xf32>
    %cst_75 = arith.constant 1.000000e+00 : f32
    %122 = vector.broadcast %cst_75 : f32 to vector<8x32xf32>
    %123 = arith.addf %122, %121 : vector<8x32xf32>
    %124 = arith.divf %122, %123 : vector<8x32xf32>
    %125 = arith.negf %109 : vector<8x32xf32>
    %126 = math.exp %125 : vector<8x32xf32>
    %cst_76 = arith.constant 1.000000e+00 : f32
    %127 = vector.broadcast %cst_76 : f32 to vector<8x32xf32>
    %128 = arith.addf %127, %126 : vector<8x32xf32>
    %129 = arith.divf %127, %128 : vector<8x32xf32>
    %130 = math.tanh %114 : vector<8x32xf32>
    %131 = arith.negf %119 : vector<8x32xf32>
    %132 = math.exp %131 : vector<8x32xf32>
    %cst_77 = arith.constant 1.000000e+00 : f32
    %133 = vector.broadcast %cst_77 : f32 to vector<8x32xf32>
    %134 = arith.addf %133, %132 : vector<8x32xf32>
    %135 = arith.divf %133, %134 : vector<8x32xf32>
    %136 = arith.mulf %129, %97 : vector<8x32xf32>
    %137 = arith.mulf %124, %130 : vector<8x32xf32>
    %138 = arith.addf %136, %137 : vector<8x32xf32>
    %139 = math.tanh %138 : vector<8x32xf32>
    %140 = arith.mulf %135, %139 : vector<8x32xf32>
    %c2_i32 = arith.constant 2 : i32
    %141 = arith.index_cast %c2_i32 : i32 to index
    %c0_78 = arith.constant 0 : index
    %c0_79 = arith.constant 0 : index
    %142 = vector.load %arg10[%141, %c0_78, %c0_79] : memref<8x8x32xf32, #tpu.memory_space<vmem>>, vector<1x8x32xf32>
    %143 = vector.shape_cast %142 : vector<1x8x32xf32> to vector<8x32xf32>
    %cst_80 = arith.constant dense<0.000000e+00> : vector<8x32xf32>
    %144 = tpu.matmul %140, %50, %cst_80 {dimension_numbers = #tpu.dot_dimension_numbers<[1], [0], [0], [1], [0, 0, 1, 1], [], []>} : vector<8x32xf32>, vector<32x32xf32>, vector<8x32xf32> -> vector<8x32xf32>
    %145 = arith.addf %143, %144 : vector<8x32xf32>
    %146 = arith.index_cast %c2_i32 : i32 to index
    %c0_81 = arith.constant 0 : index
    %c0_82 = arith.constant 0 : index
    %147 = vector.load %arg11[%146, %c0_81, %c0_82] : memref<8x8x32xf32, #tpu.memory_space<vmem>>, vector<1x8x32xf32>
    %148 = vector.shape_cast %147 : vector<1x8x32xf32> to vector<8x32xf32>
    %cst_83 = arith.constant dense<0.000000e+00> : vector<8x32xf32>
    %149 = tpu.matmul %140, %52, %cst_83 {dimension_numbers = #tpu.dot_dimension_numbers<[1], [0], [0], [1], [0, 0, 1, 1], [], []>} : vector<8x32xf32>, vector<32x32xf32>, vector<8x32xf32> -> vector<8x32xf32>
    %150 = arith.addf %148, %149 : vector<8x32xf32>
    %151 = arith.index_cast %c2_i32 : i32 to index
    %c0_84 = arith.constant 0 : index
    %c0_85 = arith.constant 0 : index
    %152 = vector.load %arg12[%151, %c0_84, %c0_85] : memref<8x8x32xf32, #tpu.memory_space<vmem>>, vector<1x8x32xf32>
    %153 = vector.shape_cast %152 : vector<1x8x32xf32> to vector<8x32xf32>
    %cst_86 = arith.constant dense<0.000000e+00> : vector<8x32xf32>
    %154 = tpu.matmul %140, %54, %cst_86 {dimension_numbers = #tpu.dot_dimension_numbers<[1], [0], [0], [1], [0, 0, 1, 1], [], []>} : vector<8x32xf32>, vector<32x32xf32>, vector<8x32xf32> -> vector<8x32xf32>
    %155 = arith.addf %153, %154 : vector<8x32xf32>
    %156 = arith.index_cast %c2_i32 : i32 to index
    %c0_87 = arith.constant 0 : index
    %c0_88 = arith.constant 0 : index
    %157 = vector.load %arg13[%156, %c0_87, %c0_88] : memref<8x8x32xf32, #tpu.memory_space<vmem>>, vector<1x8x32xf32>
    %158 = vector.shape_cast %157 : vector<1x8x32xf32> to vector<8x32xf32>
    %cst_89 = arith.constant dense<0.000000e+00> : vector<8x32xf32>
    %159 = tpu.matmul %140, %56, %cst_89 {dimension_numbers = #tpu.dot_dimension_numbers<[1], [0], [0], [1], [0, 0, 1, 1], [], []>} : vector<8x32xf32>, vector<32x32xf32>, vector<8x32xf32> -> vector<8x32xf32>
    %160 = arith.addf %158, %159 : vector<8x32xf32>
    %161 = arith.negf %145 : vector<8x32xf32>
    %162 = math.exp %161 : vector<8x32xf32>
    %cst_90 = arith.constant 1.000000e+00 : f32
    %163 = vector.broadcast %cst_90 : f32 to vector<8x32xf32>
    %164 = arith.addf %163, %162 : vector<8x32xf32>
    %165 = arith.divf %163, %164 : vector<8x32xf32>
    %166 = arith.negf %150 : vector<8x32xf32>
    %167 = math.exp %166 : vector<8x32xf32>
    %cst_91 = arith.constant 1.000000e+00 : f32
    %168 = vector.broadcast %cst_91 : f32 to vector<8x32xf32>
    %169 = arith.addf %168, %167 : vector<8x32xf32>
    %170 = arith.divf %168, %169 : vector<8x32xf32>
    %171 = math.tanh %155 : vector<8x32xf32>
    %172 = arith.negf %160 : vector<8x32xf32>
    %173 = math.exp %172 : vector<8x32xf32>
    %cst_92 = arith.constant 1.000000e+00 : f32
    %174 = vector.broadcast %cst_92 : f32 to vector<8x32xf32>
    %175 = arith.addf %174, %173 : vector<8x32xf32>
    %176 = arith.divf %174, %175 : vector<8x32xf32>
    %177 = arith.mulf %170, %138 : vector<8x32xf32>
    %178 = arith.mulf %165, %171 : vector<8x32xf32>
    %179 = arith.addf %177, %178 : vector<8x32xf32>
    %180 = math.tanh %179 : vector<8x32xf32>
    %181 = arith.mulf %176, %180 : vector<8x32xf32>
    %c3_i32 = arith.constant 3 : i32
    %182 = arith.index_cast %c3_i32 : i32 to index
    %c0_93 = arith.constant 0 : index
    %c0_94 = arith.constant 0 : index
    %183 = vector.load %arg10[%182, %c0_93, %c0_94] : memref<8x8x32xf32, #tpu.memory_space<vmem>>, vector<1x8x32xf32>
    %184 = vector.shape_cast %183 : vector<1x8x32xf32> to vector<8x32xf32>
    %cst_95 = arith.constant dense<0.000000e+00> : vector<8x32xf32>
    %185 = tpu.matmul %181, %50, %cst_95 {dimension_numbers = #tpu.dot_dimension_numbers<[1], [0], [0], [1], [0, 0, 1, 1], [], []>} : vector<8x32xf32>, vector<32x32xf32>, vector<8x32xf32> -> vector<8x32xf32>
    %186 = arith.addf %184, %185 : vector<8x32xf32>
    %187 = arith.index_cast %c3_i32 : i32 to index
    %c0_96 = arith.constant 0 : index
    %c0_97 = arith.constant 0 : index
    %188 = vector.load %arg11[%187, %c0_96, %c0_97] : memref<8x8x32xf32, #tpu.memory_space<vmem>>, vector<1x8x32xf32>
    %189 = vector.shape_cast %188 : vector<1x8x32xf32> to vector<8x32xf32>
    %cst_98 = arith.constant dense<0.000000e+00> : vector<8x32xf32>
    %190 = tpu.matmul %181, %52, %cst_98 {dimension_numbers = #tpu.dot_dimension_numbers<[1], [0], [0], [1], [0, 0, 1, 1], [], []>} : vector<8x32xf32>, vector<32x32xf32>, vector<8x32xf32> -> vector<8x32xf32>
    %191 = arith.addf %189, %190 : vector<8x32xf32>
    %192 = arith.index_cast %c3_i32 : i32 to index
    %c0_99 = arith.constant 0 : index
    %c0_100 = arith.constant 0 : index
    %193 = vector.load %arg12[%192, %c0_99, %c0_100] : memref<8x8x32xf32, #tpu.memory_space<vmem>>, vector<1x8x32xf32>
    %194 = vector.shape_cast %193 : vector<1x8x32xf32> to vector<8x32xf32>
    %cst_101 = arith.constant dense<0.000000e+00> : vector<8x32xf32>
    %195 = tpu.matmul %181, %54, %cst_101 {dimension_numbers = #tpu.dot_dimension_numbers<[1], [0], [0], [1], [0, 0, 1, 1], [], []>} : vector<8x32xf32>, vector<32x32xf32>, vector<8x32xf32> -> vector<8x32xf32>
    %196 = arith.addf %194, %195 : vector<8x32xf32>
    %197 = arith.index_cast %c3_i32 : i32 to index
    %c0_102 = arith.constant 0 : index
    %c0_103 = arith.constant 0 : index
    %198 = vector.load %arg13[%197, %c0_102, %c0_103] : memref<8x8x32xf32, #tpu.memory_space<vmem>>, vector<1x8x32xf32>
    %199 = vector.shape_cast %198 : vector<1x8x32xf32> to vector<8x32xf32>
    %cst_104 = arith.constant dense<0.000000e+00> : vector<8x32xf32>
    %200 = tpu.matmul %181, %56, %cst_104 {dimension_numbers = #tpu.dot_dimension_numbers<[1], [0], [0], [1], [0, 0, 1, 1], [], []>} : vector<8x32xf32>, vector<32x32xf32>, vector<8x32xf32> -> vector<8x32xf32>
    %201 = arith.addf %199, %200 : vector<8x32xf32>
    %202 = arith.negf %186 : vector<8x32xf32>
    %203 = math.exp %202 : vector<8x32xf32>
    %cst_105 = arith.constant 1.000000e+00 : f32
    %204 = vector.broadcast %cst_105 : f32 to vector<8x32xf32>
    %205 = arith.addf %204, %203 : vector<8x32xf32>
    %206 = arith.divf %204, %205 : vector<8x32xf32>
    %207 = arith.negf %191 : vector<8x32xf32>
    %208 = math.exp %207 : vector<8x32xf32>
    %cst_106 = arith.constant 1.000000e+00 : f32
    %209 = vector.broadcast %cst_106 : f32 to vector<8x32xf32>
    %210 = arith.addf %209, %208 : vector<8x32xf32>
    %211 = arith.divf %209, %210 : vector<8x32xf32>
    %212 = math.tanh %196 : vector<8x32xf32>
    %213 = arith.negf %201 : vector<8x32xf32>
    %214 = math.exp %213 : vector<8x32xf32>
    %cst_107 = arith.constant 1.000000e+00 : f32
    %215 = vector.broadcast %cst_107 : f32 to vector<8x32xf32>
    %216 = arith.addf %215, %214 : vector<8x32xf32>
    %217 = arith.divf %215, %216 : vector<8x32xf32>
    %218 = arith.mulf %211, %179 : vector<8x32xf32>
    %219 = arith.mulf %206, %212 : vector<8x32xf32>
    %220 = arith.addf %218, %219 : vector<8x32xf32>
    %221 = math.tanh %220 : vector<8x32xf32>
    %222 = arith.mulf %217, %221 : vector<8x32xf32>
    %c4_i32 = arith.constant 4 : i32
    %223 = arith.index_cast %c4_i32 : i32 to index
    %c0_108 = arith.constant 0 : index
    %c0_109 = arith.constant 0 : index
    %224 = vector.load %arg10[%223, %c0_108, %c0_109] : memref<8x8x32xf32, #tpu.memory_space<vmem>>, vector<1x8x32xf32>
    %225 = vector.shape_cast %224 : vector<1x8x32xf32> to vector<8x32xf32>
    %cst_110 = arith.constant dense<0.000000e+00> : vector<8x32xf32>
    %226 = tpu.matmul %222, %50, %cst_110 {dimension_numbers = #tpu.dot_dimension_numbers<[1], [0], [0], [1], [0, 0, 1, 1], [], []>} : vector<8x32xf32>, vector<32x32xf32>, vector<8x32xf32> -> vector<8x32xf32>
    %227 = arith.addf %225, %226 : vector<8x32xf32>
    %228 = arith.index_cast %c4_i32 : i32 to index
    %c0_111 = arith.constant 0 : index
    %c0_112 = arith.constant 0 : index
    %229 = vector.load %arg11[%228, %c0_111, %c0_112] : memref<8x8x32xf32, #tpu.memory_space<vmem>>, vector<1x8x32xf32>
    %230 = vector.shape_cast %229 : vector<1x8x32xf32> to vector<8x32xf32>
    %cst_113 = arith.constant dense<0.000000e+00> : vector<8x32xf32>
    %231 = tpu.matmul %222, %52, %cst_113 {dimension_numbers = #tpu.dot_dimension_numbers<[1], [0], [0], [1], [0, 0, 1, 1], [], []>} : vector<8x32xf32>, vector<32x32xf32>, vector<8x32xf32> -> vector<8x32xf32>
    %232 = arith.addf %230, %231 : vector<8x32xf32>
    %233 = arith.index_cast %c4_i32 : i32 to index
    %c0_114 = arith.constant 0 : index
    %c0_115 = arith.constant 0 : index
    %234 = vector.load %arg12[%233, %c0_114, %c0_115] : memref<8x8x32xf32, #tpu.memory_space<vmem>>, vector<1x8x32xf32>
    %235 = vector.shape_cast %234 : vector<1x8x32xf32> to vector<8x32xf32>
    %cst_116 = arith.constant dense<0.000000e+00> : vector<8x32xf32>
    %236 = tpu.matmul %222, %54, %cst_116 {dimension_numbers = #tpu.dot_dimension_numbers<[1], [0], [0], [1], [0, 0, 1, 1], [], []>} : vector<8x32xf32>, vector<32x32xf32>, vector<8x32xf32> -> vector<8x32xf32>
    %237 = arith.addf %235, %236 : vector<8x32xf32>
    %238 = arith.index_cast %c4_i32 : i32 to index
    %c0_117 = arith.constant 0 : index
    %c0_118 = arith.constant 0 : index
    %239 = vector.load %arg13[%238, %c0_117, %c0_118] : memref<8x8x32xf32, #tpu.memory_space<vmem>>, vector<1x8x32xf32>
    %240 = vector.shape_cast %239 : vector<1x8x32xf32> to vector<8x32xf32>
    %cst_119 = arith.constant dense<0.000000e+00> : vector<8x32xf32>
    %241 = tpu.matmul %222, %56, %cst_119 {dimension_numbers = #tpu.dot_dimension_numbers<[1], [0], [0], [1], [0, 0, 1, 1], [], []>} : vector<8x32xf32>, vector<32x32xf32>, vector<8x32xf32> -> vector<8x32xf32>
    %242 = arith.addf %240, %241 : vector<8x32xf32>
    %243 = arith.negf %227 : vector<8x32xf32>
    %244 = math.exp %243 : vector<8x32xf32>
    %cst_120 = arith.constant 1.000000e+00 : f32
    %245 = vector.broadcast %cst_120 : f32 to vector<8x32xf32>
    %246 = arith.addf %245, %244 : vector<8x32xf32>
    %247 = arith.divf %245, %246 : vector<8x32xf32>
    %248 = arith.negf %232 : vector<8x32xf32>
    %249 = math.exp %248 : vector<8x32xf32>
    %cst_121 = arith.constant 1.000000e+00 : f32
    %250 = vector.broadcast %cst_121 : f32 to vector<8x32xf32>
    %251 = arith.addf %250, %249 : vector<8x32xf32>
    %252 = arith.divf %250, %251 : vector<8x32xf32>
    %253 = math.tanh %237 : vector<8x32xf32>
    %254 = arith.negf %242 : vector<8x32xf32>
    %255 = math.exp %254 : vector<8x32xf32>
    %cst_122 = arith.constant 1.000000e+00 : f32
    %256 = vector.broadcast %cst_122 : f32 to vector<8x32xf32>
    %257 = arith.addf %256, %255 : vector<8x32xf32>
    %258 = arith.divf %256, %257 : vector<8x32xf32>
    %259 = arith.mulf %252, %220 : vector<8x32xf32>
    %260 = arith.mulf %247, %253 : vector<8x32xf32>
    %261 = arith.addf %259, %260 : vector<8x32xf32>
    %262 = math.tanh %261 : vector<8x32xf32>
    %263 = arith.mulf %258, %262 : vector<8x32xf32>
    %c5_i32 = arith.constant 5 : i32
    %264 = arith.index_cast %c5_i32 : i32 to index
    %c0_123 = arith.constant 0 : index
    %c0_124 = arith.constant 0 : index
    %265 = vector.load %arg10[%264, %c0_123, %c0_124] : memref<8x8x32xf32, #tpu.memory_space<vmem>>, vector<1x8x32xf32>
    %266 = vector.shape_cast %265 : vector<1x8x32xf32> to vector<8x32xf32>
    %cst_125 = arith.constant dense<0.000000e+00> : vector<8x32xf32>
    %267 = tpu.matmul %263, %50, %cst_125 {dimension_numbers = #tpu.dot_dimension_numbers<[1], [0], [0], [1], [0, 0, 1, 1], [], []>} : vector<8x32xf32>, vector<32x32xf32>, vector<8x32xf32> -> vector<8x32xf32>
    %268 = arith.addf %266, %267 : vector<8x32xf32>
    %269 = arith.index_cast %c5_i32 : i32 to index
    %c0_126 = arith.constant 0 : index
    %c0_127 = arith.constant 0 : index
    %270 = vector.load %arg11[%269, %c0_126, %c0_127] : memref<8x8x32xf32, #tpu.memory_space<vmem>>, vector<1x8x32xf32>
    %271 = vector.shape_cast %270 : vector<1x8x32xf32> to vector<8x32xf32>
    %cst_128 = arith.constant dense<0.000000e+00> : vector<8x32xf32>
    %272 = tpu.matmul %263, %52, %cst_128 {dimension_numbers = #tpu.dot_dimension_numbers<[1], [0], [0], [1], [0, 0, 1, 1], [], []>} : vector<8x32xf32>, vector<32x32xf32>, vector<8x32xf32> -> vector<8x32xf32>
    %273 = arith.addf %271, %272 : vector<8x32xf32>
    %274 = arith.index_cast %c5_i32 : i32 to index
    %c0_129 = arith.constant 0 : index
    %c0_130 = arith.constant 0 : index
    %275 = vector.load %arg12[%274, %c0_129, %c0_130] : memref<8x8x32xf32, #tpu.memory_space<vmem>>, vector<1x8x32xf32>
    %276 = vector.shape_cast %275 : vector<1x8x32xf32> to vector<8x32xf32>
    %cst_131 = arith.constant dense<0.000000e+00> : vector<8x32xf32>
    %277 = tpu.matmul %263, %54, %cst_131 {dimension_numbers = #tpu.dot_dimension_numbers<[1], [0], [0], [1], [0, 0, 1, 1], [], []>} : vector<8x32xf32>, vector<32x32xf32>, vector<8x32xf32> -> vector<8x32xf32>
    %278 = arith.addf %276, %277 : vector<8x32xf32>
    %279 = arith.index_cast %c5_i32 : i32 to index
    %c0_132 = arith.constant 0 : index
    %c0_133 = arith.constant 0 : index
    %280 = vector.load %arg13[%279, %c0_132, %c0_133] : memref<8x8x32xf32, #tpu.memory_space<vmem>>, vector<1x8x32xf32>
    %281 = vector.shape_cast %280 : vector<1x8x32xf32> to vector<8x32xf32>
    %cst_134 = arith.constant dense<0.000000e+00> : vector<8x32xf32>
    %282 = tpu.matmul %263, %56, %cst_134 {dimension_numbers = #tpu.dot_dimension_numbers<[1], [0], [0], [1], [0, 0, 1, 1], [], []>} : vector<8x32xf32>, vector<32x32xf32>, vector<8x32xf32> -> vector<8x32xf32>
    %283 = arith.addf %281, %282 : vector<8x32xf32>
    %284 = arith.negf %268 : vector<8x32xf32>
    %285 = math.exp %284 : vector<8x32xf32>
    %cst_135 = arith.constant 1.000000e+00 : f32
    %286 = vector.broadcast %cst_135 : f32 to vector<8x32xf32>
    %287 = arith.addf %286, %285 : vector<8x32xf32>
    %288 = arith.divf %286, %287 : vector<8x32xf32>
    %289 = arith.negf %273 : vector<8x32xf32>
    %290 = math.exp %289 : vector<8x32xf32>
    %cst_136 = arith.constant 1.000000e+00 : f32
    %291 = vector.broadcast %cst_136 : f32 to vector<8x32xf32>
    %292 = arith.addf %291, %290 : vector<8x32xf32>
    %293 = arith.divf %291, %292 : vector<8x32xf32>
    %294 = math.tanh %278 : vector<8x32xf32>
    %295 = arith.negf %283 : vector<8x32xf32>
    %296 = math.exp %295 : vector<8x32xf32>
    %cst_137 = arith.constant 1.000000e+00 : f32
    %297 = vector.broadcast %cst_137 : f32 to vector<8x32xf32>
    %298 = arith.addf %297, %296 : vector<8x32xf32>
    %299 = arith.divf %297, %298 : vector<8x32xf32>
    %300 = arith.mulf %293, %261 : vector<8x32xf32>
    %301 = arith.mulf %288, %294 : vector<8x32xf32>
    %302 = arith.addf %300, %301 : vector<8x32xf32>
    %303 = math.tanh %302 : vector<8x32xf32>
    %304 = arith.mulf %299, %303 : vector<8x32xf32>
    %c6_i32 = arith.constant 6 : i32
    %305 = arith.index_cast %c6_i32 : i32 to index
    %c0_138 = arith.constant 0 : index
    %c0_139 = arith.constant 0 : index
    %306 = vector.load %arg10[%305, %c0_138, %c0_139] : memref<8x8x32xf32, #tpu.memory_space<vmem>>, vector<1x8x32xf32>
    %307 = vector.shape_cast %306 : vector<1x8x32xf32> to vector<8x32xf32>
    %cst_140 = arith.constant dense<0.000000e+00> : vector<8x32xf32>
    %308 = tpu.matmul %304, %50, %cst_140 {dimension_numbers = #tpu.dot_dimension_numbers<[1], [0], [0], [1], [0, 0, 1, 1], [], []>} : vector<8x32xf32>, vector<32x32xf32>, vector<8x32xf32> -> vector<8x32xf32>
    %309 = arith.addf %307, %308 : vector<8x32xf32>
    %310 = arith.index_cast %c6_i32 : i32 to index
    %c0_141 = arith.constant 0 : index
    %c0_142 = arith.constant 0 : index
    %311 = vector.load %arg11[%310, %c0_141, %c0_142] : memref<8x8x32xf32, #tpu.memory_space<vmem>>, vector<1x8x32xf32>
    %312 = vector.shape_cast %311 : vector<1x8x32xf32> to vector<8x32xf32>
    %cst_143 = arith.constant dense<0.000000e+00> : vector<8x32xf32>
    %313 = tpu.matmul %304, %52, %cst_143 {dimension_numbers = #tpu.dot_dimension_numbers<[1], [0], [0], [1], [0, 0, 1, 1], [], []>} : vector<8x32xf32>, vector<32x32xf32>, vector<8x32xf32> -> vector<8x32xf32>
    %314 = arith.addf %312, %313 : vector<8x32xf32>
    %315 = arith.index_cast %c6_i32 : i32 to index
    %c0_144 = arith.constant 0 : index
    %c0_145 = arith.constant 0 : index
    %316 = vector.load %arg12[%315, %c0_144, %c0_145] : memref<8x8x32xf32, #tpu.memory_space<vmem>>, vector<1x8x32xf32>
    %317 = vector.shape_cast %316 : vector<1x8x32xf32> to vector<8x32xf32>
    %cst_146 = arith.constant dense<0.000000e+00> : vector<8x32xf32>
    %318 = tpu.matmul %304, %54, %cst_146 {dimension_numbers = #tpu.dot_dimension_numbers<[1], [0], [0], [1], [0, 0, 1, 1], [], []>} : vector<8x32xf32>, vector<32x32xf32>, vector<8x32xf32> -> vector<8x32xf32>
    %319 = arith.addf %317, %318 : vector<8x32xf32>
    %320 = arith.index_cast %c6_i32 : i32 to index
    %c0_147 = arith.constant 0 : index
    %c0_148 = arith.constant 0 : index
    %321 = vector.load %arg13[%320, %c0_147, %c0_148] : memref<8x8x32xf32, #tpu.memory_space<vmem>>, vector<1x8x32xf32>
    %322 = vector.shape_cast %321 : vector<1x8x32xf32> to vector<8x32xf32>
    %cst_149 = arith.constant dense<0.000000e+00> : vector<8x32xf32>
    %323 = tpu.matmul %304, %56, %cst_149 {dimension_numbers = #tpu.dot_dimension_numbers<[1], [0], [0], [1], [0, 0, 1, 1], [], []>} : vector<8x32xf32>, vector<32x32xf32>, vector<8x32xf32> -> vector<8x32xf32>
    %324 = arith.addf %322, %323 : vector<8x32xf32>
    %325 = arith.negf %309 : vector<8x32xf32>
    %326 = math.exp %325 : vector<8x32xf32>
    %cst_150 = arith.constant 1.000000e+00 : f32
    %327 = vector.broadcast %cst_150 : f32 to vector<8x32xf32>
    %328 = arith.addf %327, %326 : vector<8x32xf32>
    %329 = arith.divf %327, %328 : vector<8x32xf32>
    %330 = arith.negf %314 : vector<8x32xf32>
    %331 = math.exp %330 : vector<8x32xf32>
    %cst_151 = arith.constant 1.000000e+00 : f32
    %332 = vector.broadcast %cst_151 : f32 to vector<8x32xf32>
    %333 = arith.addf %332, %331 : vector<8x32xf32>
    %334 = arith.divf %332, %333 : vector<8x32xf32>
    %335 = math.tanh %319 : vector<8x32xf32>
    %336 = arith.negf %324 : vector<8x32xf32>
    %337 = math.exp %336 : vector<8x32xf32>
    %cst_152 = arith.constant 1.000000e+00 : f32
    %338 = vector.broadcast %cst_152 : f32 to vector<8x32xf32>
    %339 = arith.addf %338, %337 : vector<8x32xf32>
    %340 = arith.divf %338, %339 : vector<8x32xf32>
    %341 = arith.mulf %334, %302 : vector<8x32xf32>
    %342 = arith.mulf %329, %335 : vector<8x32xf32>
    %343 = arith.addf %341, %342 : vector<8x32xf32>
    %344 = math.tanh %343 : vector<8x32xf32>
    %345 = arith.mulf %340, %344 : vector<8x32xf32>
    %c7_i32 = arith.constant 7 : i32
    %346 = arith.index_cast %c7_i32 : i32 to index
    %c0_153 = arith.constant 0 : index
    %c0_154 = arith.constant 0 : index
    %347 = vector.load %arg10[%346, %c0_153, %c0_154] : memref<8x8x32xf32, #tpu.memory_space<vmem>>, vector<1x8x32xf32>
    %348 = vector.shape_cast %347 : vector<1x8x32xf32> to vector<8x32xf32>
    %cst_155 = arith.constant dense<0.000000e+00> : vector<8x32xf32>
    %349 = tpu.matmul %345, %50, %cst_155 {dimension_numbers = #tpu.dot_dimension_numbers<[1], [0], [0], [1], [0, 0, 1, 1], [], []>} : vector<8x32xf32>, vector<32x32xf32>, vector<8x32xf32> -> vector<8x32xf32>
    %350 = arith.addf %348, %349 : vector<8x32xf32>
    %351 = arith.index_cast %c7_i32 : i32 to index
    %c0_156 = arith.constant 0 : index
    %c0_157 = arith.constant 0 : index
    %352 = vector.load %arg11[%351, %c0_156, %c0_157] : memref<8x8x32xf32, #tpu.memory_space<vmem>>, vector<1x8x32xf32>
    %353 = vector.shape_cast %352 : vector<1x8x32xf32> to vector<8x32xf32>
    %cst_158 = arith.constant dense<0.000000e+00> : vector<8x32xf32>
    %354 = tpu.matmul %345, %52, %cst_158 {dimension_numbers = #tpu.dot_dimension_numbers<[1], [0], [0], [1], [0, 0, 1, 1], [], []>} : vector<8x32xf32>, vector<32x32xf32>, vector<8x32xf32> -> vector<8x32xf32>
    %355 = arith.addf %353, %354 : vector<8x32xf32>
    %356 = arith.index_cast %c7_i32 : i32 to index
    %c0_159 = arith.constant 0 : index
    %c0_160 = arith.constant 0 : index
    %357 = vector.load %arg12[%356, %c0_159, %c0_160] : memref<8x8x32xf32, #tpu.memory_space<vmem>>, vector<1x8x32xf32>
    %358 = vector.shape_cast %357 : vector<1x8x32xf32> to vector<8x32xf32>
    %cst_161 = arith.constant dense<0.000000e+00> : vector<8x32xf32>
    %359 = tpu.matmul %345, %54, %cst_161 {dimension_numbers = #tpu.dot_dimension_numbers<[1], [0], [0], [1], [0, 0, 1, 1], [], []>} : vector<8x32xf32>, vector<32x32xf32>, vector<8x32xf32> -> vector<8x32xf32>
    %360 = arith.addf %358, %359 : vector<8x32xf32>
    %361 = arith.index_cast %c7_i32 : i32 to index
    %c0_162 = arith.constant 0 : index
    %c0_163 = arith.constant 0 : index
    %362 = vector.load %arg13[%361, %c0_162, %c0_163] : memref<8x8x32xf32, #tpu.memory_space<vmem>>, vector<1x8x32xf32>
    %363 = vector.shape_cast %362 : vector<1x8x32xf32> to vector<8x32xf32>
    %cst_164 = arith.constant dense<0.000000e+00> : vector<8x32xf32>
    %364 = tpu.matmul %345, %56, %cst_164 {dimension_numbers = #tpu.dot_dimension_numbers<[1], [0], [0], [1], [0, 0, 1, 1], [], []>} : vector<8x32xf32>, vector<32x32xf32>, vector<8x32xf32> -> vector<8x32xf32>
    %365 = arith.addf %363, %364 : vector<8x32xf32>
    %366 = arith.negf %350 : vector<8x32xf32>
    %367 = math.exp %366 : vector<8x32xf32>
    %cst_165 = arith.constant 1.000000e+00 : f32
    %368 = vector.broadcast %cst_165 : f32 to vector<8x32xf32>
    %369 = arith.addf %368, %367 : vector<8x32xf32>
    %370 = arith.divf %368, %369 : vector<8x32xf32>
    %371 = arith.negf %355 : vector<8x32xf32>
    %372 = math.exp %371 : vector<8x32xf32>
    %cst_166 = arith.constant 1.000000e+00 : f32
    %373 = vector.broadcast %cst_166 : f32 to vector<8x32xf32>
    %374 = arith.addf %373, %372 : vector<8x32xf32>
    %375 = arith.divf %373, %374 : vector<8x32xf32>
    %376 = math.tanh %360 : vector<8x32xf32>
    %377 = arith.negf %365 : vector<8x32xf32>
    %378 = math.exp %377 : vector<8x32xf32>
    %cst_167 = arith.constant 1.000000e+00 : f32
    %379 = vector.broadcast %cst_167 : f32 to vector<8x32xf32>
    %380 = arith.addf %379, %378 : vector<8x32xf32>
    %381 = arith.divf %379, %380 : vector<8x32xf32>
    %382 = arith.mulf %375, %343 : vector<8x32xf32>
    %383 = arith.mulf %370, %376 : vector<8x32xf32>
    %384 = arith.addf %382, %383 : vector<8x32xf32>
    %385 = math.tanh %384 : vector<8x32xf32>
    %386 = arith.mulf %381, %385 : vector<8x32xf32>
    %c8_i32 = arith.constant 8 : i32
    %c0_168 = arith.constant 0 : index
    %c0_169 = arith.constant 0 : index
    %387 = vector.load %arg8[%c0_168, %c0_169] : memref<8x32xf32, #tpu.memory_space<vmem>>, vector<8x32xf32>
    tpu.vector_store %arg8[%c0_168, %c0_169], %386 {strides = array<i32>} : memref<8x32xf32, #tpu.memory_space<vmem>>, vector<8x32xf32>,
    %c0_170 = arith.constant 0 : index
    %c0_171 = arith.constant 0 : index
    %388 = vector.load %arg9[%c0_170, %c0_171] : memref<8x32xf32, #tpu.memory_space<vmem>>, vector<8x32xf32>
    tpu.vector_store %arg9[%c0_170, %c0_171], %384 {strides = array<i32>} : memref<8x32xf32, #tpu.memory_space<vmem>>, vector<8x32xf32>,
    %c0_172 = arith.constant 0 : index
    %c0_173 = arith.constant 0 : index
    %389 = vector.load %arg5[%c0_172, %c0_173] : memref<1x32xf32, #tpu.memory_space<vmem>>, vector<1x32xf32>
    %390 = vector.broadcast %389 : vector<1x32xf32> to vector<8x32xf32>
    %391 = arith.mulf %386, %390 : vector<8x32xf32>
    %cst_174 = arith.constant dense<0.000000e+00> : vector<8xf32>
    %392 = vector.multi_reduction <add>, %391, %cst_174 [1] : vector<8x32xf32> to vector<8xf32>
    %393 = vector.shape_cast %392 : vector<8xf32> to vector<8x1xf32>
    %c0_175 = arith.constant 0 : index
    %c0_176 = arith.constant 0 : index
    %394 = vector.load %arg6[%c0_175, %c0_176] : memref<1x1xf32, #tpu.memory_space<vmem>>, vector<1x1xf32>
    %395 = vector.broadcast %394 : vector<1x1xf32> to vector<8x1xf32>
    %396 = arith.addf %393, %395 : vector<8x1xf32>
    %c0_177 = arith.constant 0 : index
    %c0_178 = arith.constant 0 : index
    %397 = vector.load %arg7[%c0_177, %c0_178] : memref<8x1xf32, #tpu.memory_space<vmem>>, vector<8x1xf32>
    tpu.vector_store %arg7[%c0_177, %c0_178], %396 {strides = array<i32>} : memref<8x1xf32, #tpu.memory_space<vmem>>, vector<8x1xf32>,
    return
  }
  func.func @transform_0(%arg0: i32) -> (i32, i32, i32) {
    %c0_i32 = arith.constant 0 : i32
    %c0_i32_0 = arith.constant 0 : i32
    %c0_i32_1 = arith.constant 0 : i32
    return %c0_i32, %arg0, %c0_i32_0 : i32, i32, i32
  }
  func.func @transform_1(%arg0: i32) -> (i32, i32, i32) {
    %c0_i32 = arith.constant 0 : i32
    %c0_i32_0 = arith.constant 0 : i32
    %c0_i32_1 = arith.constant 0 : i32
    %c0_i32_2 = arith.constant 0 : i32
    return %c0_i32, %c0_i32_0, %c0_i32_1 : i32, i32, i32
  }
  func.func @transform_2(%arg0: i32) -> (i32, i32, i32) {
    %c0_i32 = arith.constant 0 : i32
    %c0_i32_0 = arith.constant 0 : i32
    %c0_i32_1 = arith.constant 0 : i32
    %c0_i32_2 = arith.constant 0 : i32
    return %c0_i32, %c0_i32_0, %c0_i32_1 : i32, i32, i32
  }
  func.func @transform_3(%arg0: i32) -> (i32, i32, i32) {
    %c0_i32 = arith.constant 0 : i32
    %c0_i32_0 = arith.constant 0 : i32
    %c0_i32_1 = arith.constant 0 : i32
    %c0_i32_2 = arith.constant 0 : i32
    return %c0_i32, %c0_i32_0, %c0_i32_1 : i32, i32, i32
  }
  func.func @transform_4(%arg0: i32) -> (i32, i32) {
    %c0_i32 = arith.constant 0 : i32
    %c0_i32_0 = arith.constant 0 : i32
    %c0_i32_1 = arith.constant 0 : i32
    return %c0_i32, %c0_i32_0 : i32, i32
  }
  func.func @transform_5(%arg0: i32) -> (i32, i32) {
    %c0_i32 = arith.constant 0 : i32
    %c0_i32_0 = arith.constant 0 : i32
    %c0_i32_1 = arith.constant 0 : i32
    return %c0_i32, %c0_i32_0 : i32, i32
  }
  func.func @transform_6(%arg0: i32) -> (i32, i32) {
    %c0_i32 = arith.constant 0 : i32
    %c0_i32_0 = arith.constant 0 : i32
    return %arg0, %c0_i32 : i32, i32
  }
  func.func @transform_7(%arg0: i32) -> (i32, i32) {
    %c0_i32 = arith.constant 0 : i32
    %c0_i32_0 = arith.constant 0 : i32
    return %arg0, %c0_i32 : i32, i32
  }
  func.func @transform_8(%arg0: i32) -> (i32, i32) {
    %c0_i32 = arith.constant 0 : i32
    %c0_i32_0 = arith.constant 0 : i32
    return %arg0, %c0_i32 : i32, i32
  }
}

</mosaic_0001>

<bundles_post_ra>
// kernel: tpu_custom_call.1
= control target key start
LH: loop header
LB: loop body
LE: loop exit
PB: predicated region body
PF: predicated region fallthrough
CT: control target
= control target key end

     0   :  { %s2349_s0 = inlined_call_operand.vmem [shape: f32[8,8,1], index: 0, kind: input, shape index: {}]   ;;  %s2350_s1 = inlined_call_operand.vmem [shape: f32[4,1,32], index: 1, kind: input, shape index: {}]   ;;  %s2351_s2 = inlined_call_operand.hbm [shape: f32[4,32,32], index: 2, kind: input, shape index: {}]   ;;  %s2352_s3 = inlined_call_operand.vmem [shape: f32[4,1,32], index: 3, kind: input, shape index: {}]   ;;  %s2353_s4 = inlined_call_operand.vmem [shape: f32[1,32], index: 4, kind: input, shape index: {}]   ;;  %s2354_s5 = inlined_call_operand.<no memory space> [shape: f32[1,1], index: 5, kind: input, shape index: {}]   ;;  %s2355_s6 = inlined_call_operand.vmem [shape: f32[8,1], index: 6, kind: output, shape index: {0}]   ;;  %s2356_s7 = inlined_call_operand.hbm [shape: f32[8,32], index: 7, kind: output, shape index: {1}]   ;;  %s2357_s8 = inlined_call_operand.hbm [shape: f32[8,32], index: 8, kind: output, shape index: {2}]  }
   0x1   :  { %v14_v0 = vstv %s2354_s5 }
   0x2   :  { %15 = vst [vmem:[#allocation6] sm:$0x1] %v14_v0 }
   0x3   :  { %16 = vsyncpa [#allocation8], 0 }
   0x4   :  { %17 = vsyncpa [#allocation9], 0 }
   0x5   :  { %18 = vsyncpa [#allocation12], 0  ;;  %s27_s9 = sshll.u32 %s2351_s2, 4  ;;  %s1862_s10 = smov [#allocation7]   ;;  %s28_s9 = int_to_ptr.hbm [resolvable:$true] %s27_s9 }
   0x6   :  { %s29_s11 = sshll.u32 %s1862_s10, 4  ;;  %s1863_s12 = smov 128   ;;  %s30_s11 = int_to_ptr.vmem [resolvable:$true] %s29_s11 }
   0x7   :  { %s1864_s13 = smov 8  }
   0x8   :  { %35 = dma.hbm_to_vmem [thread:$0]  %s28_s9, 2048, %s30_s11, [#allocation8], %s1863_s12, %s1863_s12, %s1864_s13  }
   0x9   :  { %1856 = dma.done.wait [#allocation8], 2048  }
   0xa   :  { %1857 = vsyncadd [#allocation8], 4294965248  ;;  %v1865_v1 = vmov 0   ;;  %v1920_v2 = vld [vmem:[#allocation7 + $0x18] sm:$0xff]  ;;  %v1933_v7 = vld [vmem:[#allocation7 + $0x10] sm:$0xff]  ;;  %v1866_v20 = vmov 0.0  }
   0xb   :  { %1627 = vset.pattern.permute.xlu0 %v1865_v1  ;;  %1628 = vset.pattern.permute.xlu1 %v1865_v1  ;;  %v1922_v3 = vld [vmem:[#allocation7 + $0x38] sm:$0xff]  ;;  %v1937_v8 = vld [vmem:[#allocation7 + $0x30] sm:$0xff]  ;;  %v1944_v11 = vld [vmem:[#allocation7 + $0x8] sm:$0xff]  ;;  %vm118_vm0 = vcmask 261120   ;;  %s1534_s21 = sshll.u32 %s2356_s7, 4  ;;  %s1868_s22 = smov [#allocation11]   ;;  %s1535_s21 = int_to_ptr.hbm [resolvable:$true] %s1534_s21 }
   0xc   :  { %1629 = vset.pattern.permute.xlu2 %v1865_v1  ;;  %v1924_v4 = vld [vmem:[#allocation7 + $0x58] sm:$0xff]  ;;  %264 = vmatpush.msra.mxu0 %v1920_v2  ;;  %v1939_v9 = vld [vmem:[#allocation7 + $0x50] sm:$0xff]  ;;  %v1946_v12 = vld [vmem:[#allocation7 + $0x28] sm:$0xff]  ;;  %s1543_s23 = sshll.u32 %s1868_s22, 4  ;;  %s1545_s26 = sshll.u32 %s2357_s8, 4  ;;  %s1544_s23 = int_to_ptr.vmem [resolvable:$true] %s1543_s23  ;;  %s1546_s26 = int_to_ptr.hbm [resolvable:$true] %s1545_s26 }
   0xd   :  { %286 = vmatpush.msra.mxu1 %v1922_v3  ;;  %v1928_v5 = vld [vmem:[#allocation7 + $0x78] sm:$0xff]  ;;  %308 = vmatpush.msra.mxu2 %v1924_v4  ;;  %v1941_v10 = vld [vmem:[#allocation7 + $0x70] sm:$0xff]  ;;  %v1948_v13 = vld [vmem:[#allocation7 + $0x48] sm:$0xff] }
   0xe   :  { %v46_v6 = vld [vmem:[%s2349_s0] sm:$0xff]  ;;  %330 = vmatpush.msra.mxu3 %v1928_v5  ;;  %265 = vmatpush.msra.mxu0 %v1933_v7  ;;  %v1952_v14 = vld [vmem:[#allocation7 + $0x68] sm:$0xff] }
   0xf   :  { %57 = vperm.xlu0 %1627, %v46_v6   ;;  %287 = vmatpush.msra.mxu1 %v1937_v8  ;;  %v1954_v15 = vld [vmem:[#allocation7] sm:$0xff]  ;;  %v52_v21 = vld [vmem:[%s2349_s0 + $0x30] sm:$0xff]  ;;  %v2012_v22 = vld [vmem:[%s2350_s1] ss:$0 sm:$0xff] }
  0x10   :  { %309 = vmatpush.msra.mxu2 %v1939_v9  ;;  %331 = vmatpush.msra.mxu3 %v1941_v10  ;;  %v1958_v16 = vld [vmem:[#allocation7 + $0x20] sm:$0xff]  ;;  %v2032_v26 = vld [vmem:[%s2352_s3] ss:$0 sm:$0xff] }
  0x11   :  { %266 = vmatpush.msra.mxu0 %v1944_v11  ;;  %v1960_v17 = vld [vmem:[#allocation7 + $0x40] sm:$0xff]  ;;  %288 = vmatpush.msra.mxu1 %v1946_v12 }
  0x12   :  { %310 = vmatpush.msra.mxu2 %v1948_v13  ;;  %v1964_v18 = vld [vmem:[#allocation7 + $0x60] sm:$0xff]  ;;  %332 = vmatpush.msra.mxu3 %v1952_v14 }
  0x13   :  { %267 = vmatpush.msra.mxu0 %v1954_v15  ;;  %289 = vmatpush.msra.mxu1 %v1958_v16  ;;  %v47_v19 = vld [vmem:[%s2349_s0 + $0x8] sm:$0xff]  ;;  %v2017_v23 = vld [vmem:[%s2350_s1 + $0x1] ss:$0 sm:$0xff]  ;;  %v2022_v24 = vld [vmem:[%s2350_s1 + $0x2] ss:$0 sm:$0xff] }
  0x14   :  { %311 = vmatpush.msra.mxu2 %v1960_v17  ;;  %333 = vmatpush.msra.mxu3 %v1964_v18  ;;  %v2027_v25 = vld [vmem:[%s2350_s1 + $0x3] ss:$0 sm:$0xff]  ;;  %v2037_v27 = vld [vmem:[%s2352_s3 + $0x1] ss:$0 sm:$0xff]  ;;  %v2042_v28 = vld [vmem:[%s2352_s3 + $0x2] ss:$0 sm:$0xff] }
  0x15   :  { %268 = vmatmul.f32.vlgmr.msra.gmra.mxu0 %v1866_v20  ;;  %290 = vmatmul.f32.vlgmr.msra.gmra.mxu1 %v1866_v20  ;;  %v2047_v29 = vld [vmem:[%s2352_s3 + $0x3] ss:$0 sm:$0xff] }
  0x16   :  { %312 = vmatmul.f32.vlgmr.msra.gmra.mxu2 %v1866_v20  ;;  %334 = vmatmul.f32.vlgmr.msra.gmra.mxu3 %v1866_v20 }
  0x17   :  { %62 = vperm.xlu0 %1627, %v47_v19   ;;  %419 = vmatpush.msrb.mxu0 %v1920_v2 }
  0x18   :  { %442 = vmatpush.msrb.mxu1 %v1922_v3  ;;  %465 = vmatpush.msrb.mxu2 %v1924_v4 }
  0x19   :  { %488 = vmatpush.msrb.mxu3 %v1928_v5  ;;  %420 = vmatpush.msrb.mxu0 %v1933_v7 }
  0x1a   :  { %443 = vmatpush.msrb.mxu1 %v1937_v8  ;;  %466 = vmatpush.msrb.mxu2 %v1939_v9 }
  0x1b   :  { %489 = vmatpush.msrb.mxu3 %v1941_v10  ;;  %421 = vmatpush.msrb.mxu0 %v1944_v11 }
  0x1c   :  { %444 = vmatpush.msrb.mxu1 %v1946_v12  ;;  %467 = vmatpush.msrb.mxu2 %v1948_v13 }
  0x1d   :  { %490 = vmatpush.msrb.mxu3 %v1952_v14  ;;  %422 = vmatpush.msrb.mxu0 %v1954_v15 }
  0x1e   :  { %445 = vmatpush.msrb.mxu1 %v1958_v16  ;;  %468 = vmatpush.msrb.mxu2 %v1960_v17 }
  0x1f   :  { %87 = vperm.xlu0 %1627, %v52_v21   ;;  %491 = vmatpush.msrb.mxu3 %v1964_v18 }
  0x20   :  { %577 = vmatpush.msra.mxu0 %v1920_v2  ;;  %600 = vmatpush.msra.mxu1 %v1922_v3 }
  0x21   :  { %623 = vmatpush.msra.mxu2 %v1924_v4  ;;  %646 = vmatpush.msra.mxu3 %v1928_v5 }
  0x22   :  { %578 = vmatpush.msra.mxu0 %v1933_v7  ;;  %601 = vmatpush.msra.mxu1 %v1937_v8 }
  0x23   :  { %624 = vmatpush.msra.mxu2 %v1939_v9  ;;  %647 = vmatpush.msra.mxu3 %v1941_v10 }
  0x24   :  { %579 = vmatpush.msra.mxu0 %v1944_v11  ;;  %602 = vmatpush.msra.mxu1 %v1946_v12 }
  0x25   :  { %625 = vmatpush.msra.mxu2 %v1948_v13  ;;  %648 = vmatpush.msra.mxu3 %v1952_v14 }
  0x26   :  { %580 = vmatpush.msra.mxu0 %v1954_v15  ;;  %603 = vmatpush.msra.mxu1 %v1958_v16 }
  0x27   :  { %626 = vmatpush.msra.mxu2 %v1960_v17  ;;  %649 = vmatpush.msra.mxu3 %v1964_v18 }
  0x81   :  { %v58_v30 = vpop.permute.xlu0 %57 }
  0x82   :  { %v98_v31 = vmul.f32 %v2012_v22, %v58_v30  ;;  %v132_v32 = vmul.f32 %v2017_v23, %v58_v30  ;;  %v166_v33 = vmul.f32 %v2022_v24, %v58_v30  ;;  %v200_v34 = vmul.f32 %v2027_v25, %v58_v30 }
  0x84   :  { %v110_v35 = vadd.f32 %v2032_v26, %v98_v31  ;;  %v145_v36 = vadd.f32 %v2037_v27, %v132_v32  ;;  %v179_v37 = vadd.f32 %v2042_v28, %v166_v33  ;;  %v213_v38 = vadd.f32 %v2047_v29, %v200_v34 }
  0x86   :  { %119 = vst.msk [vmem:[#allocation2] sm:$0xff] %vm118_vm0, %v110_v35 }
  0x87   :  { %153 = vst.msk [vmem:[#allocation3] sm:$0xff] %vm118_vm0, %v145_v36 }
  0x88   :  { %187 = vst.msk [vmem:[#allocation4] sm:$0xff] %vm118_vm0, %v179_v37 }
  0x89   :  { %221 = vst.msk [vmem:[#allocation5] sm:$0xff] %vm118_vm0, %v213_v38  ;;  %v63_v39 = vpop.permute.xlu0 %62 }
  0x8a   :  { %v99_v40 = vmul.f32 %v2012_v22, %v63_v39  ;;  %v133_v41 = vmul.f32 %v2017_v23, %v63_v39  ;;  %v167_v42 = vmul.f32 %v2022_v24, %v63_v39  ;;  %v201_v43 = vmul.f32 %v2027_v25, %v63_v39 }
  0x8c   :  { %v111_v44 = vadd.f32 %v2032_v26, %v99_v40  ;;  %v146_v45 = vadd.f32 %v2037_v27, %v133_v41  ;;  %v180_v46 = vadd.f32 %v2042_v28, %v167_v42  ;;  %v214_v47 = vadd.f32 %v2047_v29, %v201_v43 }
  0x8d   :  { %v248_v48 = vld [vmem:[#allocation2] sm:$0xff] }
  0x8e   :  { %120 = vst.msk [vmem:[#allocation2 + $0x8] sm:$0xff] %vm118_vm0, %v111_v44  ;;  %v273_v55 = vld [vmem:[#allocation3] sm:$0xff] }
  0x8f   :  { %154 = vst.msk [vmem:[#allocation3 + $0x8] sm:$0xff] %vm118_vm0, %v146_v45  ;;  %v295_v35 = vld [vmem:[#allocation4] sm:$0xff] }
  0x90   :  { %188 = vst.msk [vmem:[#allocation4 + $0x8] sm:$0xff] %vm118_vm0, %v180_v46  ;;  %v317_v1 = vld [vmem:[#allocation5] sm:$0xff] }
  0x91   :  { %222 = vst.msk [vmem:[#allocation5 + $0x8] sm:$0xff] %vm118_vm0, %v214_v47  ;;  %v88_v49 = vpop.permute.xlu0 %87 }
  0x92   :  { %v104_v50 = vmul.f32 %v2012_v22, %v88_v49  ;;  %v138_v51 = vmul.f32 %v2017_v23, %v88_v49  ;;  %v172_v52 = vmul.f32 %v2022_v24, %v88_v49  ;;  %v206_v53 = vmul.f32 %v2027_v25, %v88_v49  ;;  %v269_v54 = vpop.f32.mrf.mxu0  ;;  %v291_v57 = vpop.f32.mrf.mxu1 }
  0x93   :  { %v272_v56 = vadd.f32 %v269_v54, %v248_v48  ;;  %v294_v63 = vadd.f32 %v291_v57, %v273_v55 }
  0x94   :  { %v116_v58 = vadd.f32 %v2032_v26, %v104_v50  ;;  %v151_v59 = vadd.f32 %v2037_v27, %v138_v51  ;;  %v185_v60 = vadd.f32 %v2042_v28, %v172_v52  ;;  %v219_v61 = vadd.f32 %v2047_v29, %v206_v53 }
  0x95   :  { %v1568_v62 = vmul.f32 -1.442695, %v272_v56  ;;  %v1569_v0 = vmul.f32 -1.442695, %v294_v63 }
  0x96   :  { %125 = vst.msk [vmem:[#allocation2 + $0x30] sm:$0xff] %vm118_vm0, %v116_v58 }
  0x97   :  { %159 = vst.msk [vmem:[#allocation3 + $0x30] sm:$0xff] %vm118_vm0, %v151_v59  ;;  %1640 = vpow2.f32 %v1568_v62 }
  0x98   :  { %193 = vst.msk [vmem:[#allocation4 + $0x30] sm:$0xff] %vm118_vm0, %v185_v60  ;;  %1642 = vpow2.f32 %v1569_v0 }
  0x99   :  { %227 = vst.msk [vmem:[#allocation5 + $0x30] sm:$0xff] %vm118_vm0, %v219_v61  ;;  %v335_v6 = vpop.f32.mrf.mxu3  ;;  %v313_v33 = vpop.f32.mrf.mxu2 }
  0x9a   :  { %v338_v19 = vadd.f32 %v335_v6, %v317_v1  ;;  %v316_v37 = vadd.f32 %v313_v33, %v295_v35  ;;  %v403_v35 = vld [vmem:[#allocation2 + $0x8] sm:$0xff] }
  0x9c   :  { %v1570_v21 = vmul.f32 -1.442695, %v338_v19 }
  0x9d   :  { %v1641_v20 = vpop.eup %1640 }
  0x9e   :  { %v342_v30 = vadd.f32 1.0, %v1641_v20  ;;  %v1643_v31 = vpop.eup %1642  ;;  %1644 = vpow2.f32 %v1570_v21 }
  0x9f   :  { %v361_v32 = vadd.f32 1.0, %v1643_v31 }
  0xa0   :  { %1646 = vrcp.f32 %v342_v30  ;;  %v354_v43 = vand.u32 2147483648, %v342_v30  ;;  %v352_v46 = vand.u32 2147483647, %v342_v30  ;;  %vm348_vm2 = vweird.f32 %v342_v30 }
  0xa1   :  { %1648 = vrcp.f32 %v361_v32  ;;  %v373_v47 = vand.u32 2147483648, %v361_v32  ;;  %v371_v50 = vand.u32 2147483647, %v361_v32  ;;  %vm367_vm4 = vweird.f32 %v361_v32 }
  0xa2   :  { %v355_v52 = vor.u32 1.1754944e-38, %v354_v43  ;;  %vm353_vm6 = vcmp.eq.f32.partialorder %v352_v46, 8.507059e+37  ;;  %v49_v43 = vld [vmem:[%s2349_s0 + $0x18] sm:$0xff] }
  0xa3   :  { %v374_v57 = vor.u32 1.1754944e-38, %v373_v47  ;;  %vm372_vm8 = vcmp.eq.f32.partialorder %v371_v50, 8.507059e+37 }
  0xa4   :  { %v1645_v34 = vpop.eup %1644 }
  0xa5   :  { %v381_v38 = vadd.f32 1.0, %v1645_v34  ;;  %v48_v34 = vld [vmem:[%s2349_s0 + $0x10] sm:$0xff] }
  0xa6   :  { %v1647_v36 = vpop.eup %1646  ;;  %67 = vperm.xlu1 %1628, %v48_v34  }
  0xa7   :  { %v344_v39 = vmul.f32 %v1647_v36, %v342_v30  ;;  %v1649_v40 = vpop.eup %1648  ;;  %1650 = vrcp.f32 %v381_v38  ;;  %vm349_vm1 = vweird.f32 %v1647_v36  ;;  %v393_v19 = vand.u32 2147483648, %v381_v38 }
  0xa8   :  { %v363_v42 = vmul.f32 %v1649_v40, %v361_v32  ;;  %1652 = vtanh.f32 %v316_v37  ;;  %vm368_vm3 = vweird.f32 %v1649_v40  ;;  %vm350_vm5 = vmor %vm348_vm2, %vm349_vm1  ;;  %vm387_vm10 = vweird.f32 %v381_v38  ;;  %v429_v37 = vld [vmem:[#allocation3 + $0x8] sm:$0xff] }
  0xa9   :  { %v345_v41 = vsub.f32 1.0, %v344_v39  ;;  %vm369_vm7 = vmor %vm367_vm4, %vm368_vm3  ;;  %v391_v20 = vand.u32 2147483647, %v381_v38  ;;  %v394_v30 = vor.u32 1.1754944e-38, %v393_v19 }
  0xaa   :  { %v364_v44 = vsub.f32 1.0, %v363_v42 }
  0xab   :  { %v346_v45 = vmul.f32 %v1647_v36, %v345_v41  ;;  %vm392_vm12 = vcmp.eq.f32.partialorder %v391_v20, 8.507059e+37 }
  0xac   :  { %v365_v48 = vmul.f32 %v1649_v40, %v364_v44  ;;  %v475_v44 = vld [vmem:[#allocation5 + $0x8] sm:$0xff] }
  0xad   :  { %v347_v49 = vadd.f32 %v1647_v36, %v346_v45  ;;  %v1651_v51 = vpop.eup %1650 }
  0xae   :  { %v366_v54 = vadd.f32 %v1649_v40, %v365_v48  ;;  %v383_v55 = vmul.f32 %v1651_v51, %v381_v38  ;;  %v1653_v56 = vpop.eup %1652  ;;  %vm388_vm9 = vweird.f32 %v1651_v51  ;;  %72 = vperm.xlu1 %1628, %v49_v43   ;;  %v53_v48 = vld [vmem:[%s2349_s0 + $0x38] sm:$0xff] }
  0xaf   :  { %v351_v53 = vsel %vm350_vm5, %v1647_v36, %v347_v49  ;;  %vm389_vm11 = vmor %vm387_vm10, %vm388_vm9 }
  0xb0   :  { %v356_v58 = vsel %vm353_vm6, %v355_v52, %v351_v53  ;;  %v370_v59 = vsel %vm369_vm7, %v1649_v40, %v366_v54  ;;  %v384_v61 = vsub.f32 1.0, %v383_v55  ;;  %v452_v55 = vld [vmem:[#allocation4 + $0x8] sm:$0xff] }
  0xb1   :  { %v398_v60 = vmul.f32 %v1653_v56, %v356_v58  ;;  %v375_v62 = vsel %vm372_vm8, %v374_v57, %v370_v59 }
  0xb2   :  { %v397_v63 = vmul.f32 0.0, %v375_v62  ;;  %v385_v0 = vmul.f32 %v1651_v51, %v384_v61 }
  0xb4   :  { %v2085_v1 = vadd.f32 %v398_v60, %v397_v63  ;;  %v386_v6 = vadd.f32 %v1651_v51, %v385_v0 }
  0xb6   :  { %1654 = vtanh.f32 %v2085_v1  ;;  %v390_v21 = vsel %vm389_vm11, %v1651_v51, %v386_v6  ;;  %92 = vperm.xlu1 %1628, %v53_v48  }
  0xb7   :  { %v395_v32 = vsel %vm392_vm12, %v394_v30, %v390_v21 }
  0xbc   :  { %v1655_v31 = vpop.eup %1654 }
  0xbd   :  { %v401_v33 = vmul.f32 %v1655_v31, %v395_v32 }
  0xbf   :  { %1571 = vmatmul.msk.f32.vlgmr.msrb.gmra.mxu0 %vm118_vm0, %v401_v33  ;;  %1572 = vmatmul.msk.f32.vlgmr.msrb.gmra.mxu1 %vm118_vm0, %v401_v33 }
  0xc0   :  { %1573 = vmatmul.msk.f32.vlgmr.msrb.gmra.mxu2 %vm118_vm0, %v401_v33  ;;  %1574 = vmatmul.msk.f32.vlgmr.msrb.gmra.mxu3 %vm118_vm0, %v401_v33 }
  0xc1   :  { %735 = vmatpush.msrb.mxu0 %v1920_v2  ;;  %758 = vmatpush.msrb.mxu1 %v1922_v3 }
  0xc2   :  { %781 = vmatpush.msrb.mxu2 %v1924_v4  ;;  %804 = vmatpush.msrb.mxu3 %v1928_v5 }
  0xc3   :  { %736 = vmatpush.msrb.mxu0 %v1933_v7  ;;  %759 = vmatpush.msrb.mxu1 %v1937_v8 }
  0xc4   :  { %782 = vmatpush.msrb.mxu2 %v1939_v9  ;;  %805 = vmatpush.msrb.mxu3 %v1941_v10 }
  0xc5   :  { %737 = vmatpush.msrb.mxu0 %v1944_v11  ;;  %760 = vmatpush.msrb.mxu1 %v1946_v12 }
  0xc6   :  { %783 = vmatpush.msrb.mxu2 %v1948_v13  ;;  %806 = vmatpush.msrb.mxu3 %v1952_v14 }
  0xc7   :  { %738 = vmatpush.msrb.mxu0 %v1954_v15  ;;  %761 = vmatpush.msrb.mxu1 %v1958_v16 }
  0xc8   :  { %784 = vmatpush.msrb.mxu2 %v1960_v17  ;;  %807 = vmatpush.msrb.mxu3 %v1964_v18 }
 0x13c   :  { %v424_v36 = vpop.f32.mrf.mxu0  ;;  %v447_v38 = vpop.f32.mrf.mxu1 }
 0x13d   :  { %v427_v39 = vadd.f32 %v424_v36, %v403_v35  ;;  %v450_v40 = vadd.f32 %v447_v38, %v429_v37 }
 0x13f   :  { %v1575_v41 = vmul.f32 -1.442695, %v427_v39  ;;  %v1576_v42 = vmul.f32 -1.442695, %v450_v40 }
 0x141   :  { %1656 = vpow2.f32 %v1575_v41 }
 0x142   :  { %1658 = vpow2.f32 %v1576_v42 }
 0x143   :  { %v493_v45 = vpop.f32.mrf.mxu3  ;;  %v470_v53 = vpop.f32.mrf.mxu2 }
 0x144   :  { %v496_v46 = vadd.f32 %v493_v45, %v475_v44  ;;  %v473_v58 = vadd.f32 %v470_v53, %v452_v55 }
 0x146   :  { %v1577_v47 = vmul.f32 -1.442695, %v496_v46 }
 0x147   :  { %v1657_v49 = vpop.eup %1656 }
 0x148   :  { %v1659_v50 = vpop.eup %1658  ;;  %v500_v51 = vadd.f32 1.0, %v1657_v49  ;;  %1660 = vpow2.f32 %v1577_v47 }
 0x149   :  { %v519_v52 = vadd.f32 1.0, %v1659_v50 }
 0x14a   :  { %1662 = vrcp.f32 %v500_v51  ;;  %v512_v0 = vand.u32 2147483648, %v500_v51  ;;  %v510_v20 = vand.u32 2147483647, %v500_v51  ;;  %vm506_vm15 = vweird.f32 %v500_v51 }
 0x14b   :  { %1664 = vrcp.f32 %v519_v52  ;;  %v531_v6 = vand.u32 2147483648, %v519_v52  ;;  %v529_v30 = vand.u32 2147483647, %v519_v52  ;;  %vm525_vm1 = vweird.f32 %v519_v52 }
 0x14c   :  { %v513_v33 = vor.u32 1.1754944e-38, %v512_v0  ;;  %vm511_vm4 = vcmp.eq.f32.partialorder %v510_v20, 8.507059e+37 }
 0x14d   :  { %v532_v36 = vor.u32 1.1754944e-38, %v531_v6  ;;  %vm530_vm5 = vcmp.eq.f32.partialorder %v529_v30, 8.507059e+37 }
 0x14e   :  { %v1661_v54 = vpop.eup %1660 }
 0x14f   :  { %v539_v56 = vadd.f32 1.0, %v1661_v54 }
 0x150   :  { %v1663_v57 = vpop.eup %1662 }
 0x151   :  { %v1665_v59 = vpop.eup %1664  ;;  %v502_v60 = vmul.f32 %v1663_v57, %v500_v51  ;;  %1666 = vrcp.f32 %v539_v56  ;;  %vm507_vm13 = vweird.f32 %v1663_v57  ;;  %v551_v48 = vand.u32 2147483648, %v539_v56 }
 0x152   :  { %v521_v61 = vmul.f32 %v1665_v59, %v519_v52  ;;  %1668 = vtanh.f32 %v473_v58  ;;  %vm526_vm14 = vweird.f32 %v1665_v59  ;;  %vm508_vm2 = vmor %vm506_vm15, %vm507_vm13  ;;  %vm545_vm7 = vweird.f32 %v539_v56 }
 0x153   :  { %v503_v62 = vsub.f32 1.0, %v502_v60  ;;  %vm527_vm3 = vmor %vm525_vm1, %vm526_vm14  ;;  %v549_v49 = vand.u32 2147483647, %v539_v56  ;;  %v552_v51 = vor.u32 1.1754944e-38, %v551_v48 }
 0x154   :  { %v522_v63 = vsub.f32 1.0, %v521_v61 }
 0x155   :  { %v504_v19 = vmul.f32 %v1663_v57, %v503_v62  ;;  %vm550_vm9 = vcmp.eq.f32.partialorder %v549_v49, 8.507059e+37 }
 0x156   :  { %v523_v21 = vmul.f32 %v1665_v59, %v522_v63 }
 0x157   :  { %v1667_v31 = vpop.eup %1666  ;;  %v505_v32 = vadd.f32 %v1663_v57, %v504_v19 }
 0x158   :  { %v524_v34 = vadd.f32 %v1665_v59, %v523_v21  ;;  %v541_v35 = vmul.f32 %v1667_v31, %v539_v56  ;;  %v1669_v38 = vpop.eup %1668  ;;  %vm546_vm6 = vweird.f32 %v1667_v31 }
 0x159   :  { %v509_v37 = vsel %vm508_vm2, %v1663_v57, %v505_v32  ;;  %vm547_vm8 = vmor %vm545_vm7, %vm546_vm6 }
 0x15a   :  { %v514_v39 = vsel %vm511_vm4, %v513_v33, %v509_v37  ;;  %v528_v40 = vsel %vm527_vm3, %v1665_v59, %v524_v34  ;;  %v542_v41 = vsub.f32 1.0, %v541_v35 }
 0x15b   :  { %v533_v42 = vsel %vm530_vm5, %v532_v36, %v528_v40  ;;  %v556_v43 = vmul.f32 %v1669_v38, %v514_v39 }
 0x15c   :  { %v555_v44 = vmul.f32 %v533_v42, %v2085_v1  ;;  %v543_v45 = vmul.f32 %v1667_v31, %v542_v41  ;;  %v68_v1 = vpop.permute.xlu1 %67 }
 0x15d   :  { %v100_v55 = vmul.f32 %v2012_v22, %v68_v1  ;;  %v134_v56 = vmul.f32 %v2017_v23, %v68_v1  ;;  %v168_v57 = vmul.f32 %v2022_v24, %v68_v1  ;;  %v202_v58 = vmul.f32 %v2027_v25, %v68_v1 }
 0x15e   :  { %v2118_v46 = vadd.f32 %v556_v43, %v555_v44  ;;  %v544_v47 = vadd.f32 %v1667_v31, %v543_v45 }
 0x15f   :  { %v112_v59 = vadd.f32 %v2032_v26, %v100_v55  ;;  %v147_v60 = vadd.f32 %v2037_v27, %v134_v56  ;;  %v181_v61 = vadd.f32 %v2042_v28, %v168_v57  ;;  %v215_v62 = vadd.f32 %v2047_v29, %v202_v58 }
 0x160   :  { %1670 = vtanh.f32 %v2118_v46  ;;  %v548_v50 = vsel %vm547_vm8, %v1667_v31, %v544_v47 }
 0x161   :  { %v553_v53 = vsel %vm550_vm9, %v552_v51, %v548_v50  ;;  %121 = vst.msk [vmem:[#allocation2 + $0x10] sm:$0xff] %vm118_vm0, %v112_v59 }
 0x162   :  { %155 = vst.msk [vmem:[#allocation3 + $0x10] sm:$0xff] %vm118_vm0, %v147_v60 }
 0x163   :  { %189 = vst.msk [vmem:[#allocation4 + $0x10] sm:$0xff] %vm118_vm0, %v181_v61 }
 0x164   :  { %223 = vst.msk [vmem:[#allocation5 + $0x10] sm:$0xff] %vm118_vm0, %v215_v62  ;;  %v73_v63 = vpop.permute.xlu1 %72 }
 0x165   :  { %v101_v0 = vmul.f32 %v2012_v22, %v73_v63  ;;  %v135_v6 = vmul.f32 %v2017_v23, %v73_v63  ;;  %v169_v19 = vmul.f32 %v2022_v24, %v73_v63  ;;  %v203_v20 = vmul.f32 %v2027_v25, %v73_v63 }
 0x166   :  { %v1671_v52 = vpop.eup %1670 }
 0x167   :  { %v559_v54 = vmul.f32 %v1671_v52, %v553_v53  ;;  %v113_v21 = vadd.f32 %v2032_v26, %v101_v0  ;;  %v148_v30 = vadd.f32 %v2037_v27, %v135_v6  ;;  %v182_v31 = vadd.f32 %v2042_v28, %v169_v19 }
 0x168   :  { %v216_v32 = vadd.f32 %v2047_v29, %v203_v20  ;;  %v561_v42 = vld [vmem:[#allocation2 + $0x10] sm:$0xff] }
 0x169   :  { %1578 = vmatmul.msk.f32.vlgmr.msra.gmra.mxu0 %vm118_vm0, %v559_v54  ;;  %1579 = vmatmul.msk.f32.vlgmr.msra.gmra.mxu1 %vm118_vm0, %v559_v54  ;;  %122 = vst.msk [vmem:[#allocation2 + $0x18] sm:$0xff] %vm118_vm0, %v113_v21  ;;  %v587_v43 = vld [vmem:[#allocation3 + $0x10] sm:$0xff] }
 0x16a   :  { %1580 = vmatmul.msk.f32.vlgmr.msra.gmra.mxu2 %vm118_vm0, %v559_v54  ;;  %1581 = vmatmul.msk.f32.vlgmr.msra.gmra.mxu3 %vm118_vm0, %v559_v54  ;;  %156 = vst.msk [vmem:[#allocation3 + $0x18] sm:$0xff] %vm118_vm0, %v148_v30  ;;  %v610_v60 = vld [vmem:[#allocation4 + $0x10] sm:$0xff] }
 0x16b   :  { %893 = vmatpush.msra.mxu0 %v1920_v2  ;;  %916 = vmatpush.msra.mxu1 %v1922_v3  ;;  %190 = vst.msk [vmem:[#allocation4 + $0x18] sm:$0xff] %vm118_vm0, %v182_v31  ;;  %v633_v51 = vld [vmem:[#allocation5 + $0x10] sm:$0xff] }
 0x16c   :  { %939 = vmatpush.msra.mxu2 %v1924_v4  ;;  %962 = vmatpush.msra.mxu3 %v1928_v5  ;;  %224 = vst.msk [vmem:[#allocation5 + $0x18] sm:$0xff] %vm118_vm0, %v216_v32  ;;  %v93_v33 = vpop.permute.xlu1 %92 }
 0x16d   :  { %894 = vmatpush.msra.mxu0 %v1933_v7  ;;  %917 = vmatpush.msra.mxu1 %v1937_v8  ;;  %v105_v34 = vmul.f32 %v2012_v22, %v93_v33  ;;  %v139_v35 = vmul.f32 %v2017_v23, %v93_v33  ;;  %v173_v36 = vmul.f32 %v2022_v24, %v93_v33 }
 0x16e   :  { %940 = vmatpush.msra.mxu2 %v1939_v9  ;;  %963 = vmatpush.msra.mxu3 %v1941_v10  ;;  %v207_v37 = vmul.f32 %v2027_v25, %v93_v33 }
 0x16f   :  { %895 = vmatpush.msra.mxu0 %v1944_v11  ;;  %918 = vmatpush.msra.mxu1 %v1946_v12  ;;  %v117_v38 = vadd.f32 %v2032_v26, %v105_v34  ;;  %v152_v39 = vadd.f32 %v2037_v27, %v139_v35  ;;  %v186_v40 = vadd.f32 %v2042_v28, %v173_v36 }
 0x170   :  { %941 = vmatpush.msra.mxu2 %v1948_v13  ;;  %964 = vmatpush.msra.mxu3 %v1952_v14  ;;  %v220_v41 = vadd.f32 %v2047_v29, %v207_v37 }
 0x171   :  { %896 = vmatpush.msra.mxu0 %v1954_v15  ;;  %919 = vmatpush.msra.mxu1 %v1958_v16  ;;  %126 = vst.msk [vmem:[#allocation2 + $0x38] sm:$0xff] %vm118_vm0, %v117_v38 }
 0x172   :  { %942 = vmatpush.msra.mxu2 %v1960_v17  ;;  %965 = vmatpush.msra.mxu3 %v1964_v18  ;;  %160 = vst.msk [vmem:[#allocation3 + $0x38] sm:$0xff] %vm118_vm0, %v152_v39 }
 0x173   :  { %194 = vst.msk [vmem:[#allocation4 + $0x38] sm:$0xff] %vm118_vm0, %v186_v40 }
 0x174   :  { %228 = vst.msk [vmem:[#allocation5 + $0x38] sm:$0xff] %vm118_vm0, %v220_v41 }
 0x1e6   :  { %v582_v44 = vpop.f32.mrf.mxu0  ;;  %v605_v45 = vpop.f32.mrf.mxu1 }
 0x1e7   :  { %v585_v47 = vadd.f32 %v582_v44, %v561_v42  ;;  %v608_v48 = vadd.f32 %v605_v45, %v587_v43 }
 0x1e9   :  { %v1582_v49 = vmul.f32 -1.442695, %v585_v47  ;;  %v1583_v50 = vmul.f32 -1.442695, %v608_v48 }
 0x1eb   :  { %1672 = vpow2.f32 %v1582_v49 }
 0x1ec   :  { %1674 = vpow2.f32 %v1583_v50 }
 0x1ed   :  { %v651_v52 = vpop.f32.mrf.mxu3  ;;  %v628_v58 = vpop.f32.mrf.mxu2 }
 0x1ee   :  { %v654_v53 = vadd.f32 %v651_v52, %v633_v51  ;;  %v631_v63 = vadd.f32 %v628_v58, %v610_v60 }
 0x1f0   :  { %v1584_v54 = vmul.f32 -1.442695, %v654_v53 }
 0x1f1   :  { %v1673_v1 = vpop.eup %1672 }
 0x1f2   :  { %v1675_v55 = vpop.eup %1674  ;;  %v658_v56 = vadd.f32 1.0, %v1673_v1  ;;  %1676 = vpow2.f32 %v1584_v54 }
 0x1f3   :  { %v677_v57 = vadd.f32 1.0, %v1675_v55 }
 0x1f4   :  { %1678 = vrcp.f32 %v658_v56  ;;  %v670_v30 = vand.u32 2147483648, %v658_v56  ;;  %v668_v33 = vand.u32 2147483647, %v658_v56  ;;  %vm664_vm12 = vweird.f32 %v658_v56 }
 0x1f5   :  { %1680 = vrcp.f32 %v677_v57  ;;  %v689_v31 = vand.u32 2147483648, %v677_v57  ;;  %v687_v35 = vand.u32 2147483647, %v677_v57  ;;  %vm683_vm13 = vweird.f32 %v677_v57 }
 0x1f6   :  { %v671_v38 = vor.u32 1.1754944e-38, %v670_v30  ;;  %vm669_vm1 = vcmp.eq.f32.partialorder %v668_v33, 8.507059e+37 }
 0x1f7   :  { %v690_v41 = vor.u32 1.1754944e-38, %v689_v31  ;;  %vm688_vm2 = vcmp.eq.f32.partialorder %v687_v35, 8.507059e+37 }
 0x1f8   :  { %v1677_v59 = vpop.eup %1676 }
 0x1f9   :  { %v697_v61 = vadd.f32 1.0, %v1677_v59 }
 0x1fa   :  { %v1679_v62 = vpop.eup %1678 }
 0x1fb   :  { %v1681_v0 = vpop.eup %1680  ;;  %v660_v6 = vmul.f32 %v1679_v62, %v658_v56  ;;  %1682 = vrcp.f32 %v697_v61  ;;  %vm665_vm10 = vweird.f32 %v1679_v62  ;;  %v709_v54 = vand.u32 2147483648, %v697_v61 }
 0x1fc   :  { %v679_v19 = vmul.f32 %v1681_v0, %v677_v57  ;;  %1684 = vtanh.f32 %v631_v63  ;;  %vm684_vm11 = vweird.f32 %v1681_v0  ;;  %vm666_vm14 = vmor %vm664_vm12, %vm665_vm10  ;;  %vm703_vm4 = vweird.f32 %v697_v61 }
 0x1fd   :  { %v661_v20 = vsub.f32 1.0, %v660_v6  ;;  %vm685_vm15 = vmor %vm683_vm13, %vm684_vm11  ;;  %v707_v1 = vand.u32 2147483647, %v697_v61  ;;  %v710_v56 = vor.u32 1.1754944e-38, %v709_v54 }
 0x1fe   :  { %v680_v21 = vsub.f32 1.0, %v679_v19  ;;  %v51_v19 = vld [vmem:[%s2349_s0 + $0x28] sm:$0xff] }
 0x1ff   :  { %v662_v32 = vmul.f32 %v1679_v62, %v661_v20  ;;  %vm708_vm6 = vcmp.eq.f32.partialorder %v707_v1, 8.507059e+37 }
 0x200   :  { %v681_v34 = vmul.f32 %v1681_v0, %v680_v21 }
 0x201   :  { %v1683_v36 = vpop.eup %1682  ;;  %v663_v37 = vadd.f32 %v1679_v62, %v662_v32 }
 0x202   :  { %v682_v39 = vadd.f32 %v1681_v0, %v681_v34  ;;  %v699_v40 = vmul.f32 %v1683_v36, %v697_v61  ;;  %v1685_v43 = vpop.eup %1684  ;;  %vm704_vm3 = vweird.f32 %v1683_v36 }
 0x203   :  { %v667_v42 = vsel %vm666_vm14, %v1679_v62, %v663_v37  ;;  %vm705_vm5 = vmor %vm703_vm4, %vm704_vm3  ;;  %v768_v62 = vld [vmem:[#allocation4 + $0x18] sm:$0xff] }
 0x204   :  { %v672_v44 = vsel %vm669_vm1, %v671_v38, %v667_v42  ;;  %v686_v45 = vsel %vm685_vm15, %v1681_v0, %v682_v39  ;;  %v700_v47 = vsub.f32 1.0, %v699_v40 }
 0x205   :  { %v691_v48 = vsel %vm688_vm2, %v690_v41, %v686_v45  ;;  %v714_v49 = vmul.f32 %v1685_v43, %v672_v44 }
 0x206   :  { %v713_v50 = vmul.f32 %v691_v48, %v2118_v46  ;;  %v701_v51 = vmul.f32 %v1683_v36, %v700_v47 }
 0x208   :  { %v2178_v52 = vadd.f32 %v714_v49, %v713_v50  ;;  %v702_v53 = vadd.f32 %v1683_v36, %v701_v51 }
 0x20a   :  { %1686 = vtanh.f32 %v2178_v52  ;;  %v706_v55 = vsel %vm705_vm5, %v1683_v36, %v702_v53 }
 0x20b   :  { %v711_v58 = vsel %vm708_vm6, %v710_v56, %v706_v55 }
 0x210   :  { %v1687_v57 = vpop.eup %1686 }
 0x211   :  { %v717_v59 = vmul.f32 %v1687_v57, %v711_v58 }
 0x213   :  { %1585 = vmatmul.msk.f32.vlgmr.msrb.gmra.mxu0 %vm118_vm0, %v717_v59  ;;  %1586 = vmatmul.msk.f32.vlgmr.msrb.gmra.mxu1 %vm118_vm0, %v717_v59 }
 0x214   :  { %1587 = vmatmul.msk.f32.vlgmr.msrb.gmra.mxu2 %vm118_vm0, %v717_v59  ;;  %1588 = vmatmul.msk.f32.vlgmr.msrb.gmra.mxu3 %vm118_vm0, %v717_v59 }
 0x215   :  { %1051 = vmatpush.msrb.mxu0 %v1920_v2  ;;  %1074 = vmatpush.msrb.mxu1 %v1922_v3  ;;  %v719_v2 = vld [vmem:[#allocation2 + $0x18] sm:$0xff] }
 0x216   :  { %1097 = vmatpush.msrb.mxu2 %v1924_v4  ;;  %1120 = vmatpush.msrb.mxu3 %v1928_v5  ;;  %v745_v4 = vld [vmem:[#allocation3 + $0x18] sm:$0xff] }
 0x217   :  { %1052 = vmatpush.msrb.mxu0 %v1933_v7  ;;  %1075 = vmatpush.msrb.mxu1 %v1937_v8 }
 0x218   :  { %1098 = vmatpush.msrb.mxu2 %v1939_v9  ;;  %1121 = vmatpush.msrb.mxu3 %v1941_v10 }
 0x219   :  { %1053 = vmatpush.msrb.mxu0 %v1944_v11  ;;  %1076 = vmatpush.msrb.mxu1 %v1946_v12  ;;  %v791_v11 = vld [vmem:[#allocation5 + $0x18] sm:$0xff] }
 0x21a   :  { %1099 = vmatpush.msrb.mxu2 %v1948_v13  ;;  %1122 = vmatpush.msrb.mxu3 %v1952_v14 }
 0x21b   :  { %1054 = vmatpush.msrb.mxu0 %v1954_v15  ;;  %1077 = vmatpush.msrb.mxu1 %v1958_v16 }
 0x21c   :  { %1100 = vmatpush.msrb.mxu2 %v1960_v17  ;;  %1123 = vmatpush.msrb.mxu3 %v1964_v18  ;;  %v50_v18 = vld [vmem:[%s2349_s0 + $0x20] sm:$0xff]  ;;  %s1867_s0 = smov [#allocation10]  }
 0x21d   :  { %77 = vperm.xlu2 %1629, %v50_v18   ;;  %v2254_v18 = vld [vmem:[#allocation7 + $0x20] sm:$0xff]  ;;  %s1532_s18 = sshll.u32 %s1867_s0, 4  ;;  %s1533_s18 = int_to_ptr.vmem [resolvable:$true] %s1532_s18 }
 0x225   :  { %82 = vperm.xlu2 %1629, %v51_v19  }
 0x290   :  { %v740_v3 = vpop.f32.mrf.mxu0  ;;  %v763_v5 = vpop.f32.mrf.mxu1 }
 0x291   :  { %v743_v7 = vadd.f32 %v740_v3, %v719_v2  ;;  %v766_v8 = vadd.f32 %v763_v5, %v745_v4 }
 0x293   :  { %v1589_v9 = vmul.f32 -1.442695, %v743_v7  ;;  %v1590_v10 = vmul.f32 -1.442695, %v766_v8  ;;  %v2218_v7 = vld [vmem:[#allocation7 + $0x38] sm:$0xff] }
 0x294   :  { %v2221_v8 = vld [vmem:[#allocation7 + $0x58] sm:$0xff] }
 0x295   :  { %1688 = vpow2.f32 %v1589_v9  ;;  %v2224_v9 = vld [vmem:[#allocation7 + $0x78] sm:$0xff] }
 0x296   :  { %1690 = vpow2.f32 %v1590_v10  ;;  %v2227_v10 = vld [vmem:[#allocation7 + $0x10] sm:$0xff] }
 0x297   :  { %v809_v12 = vpop.f32.mrf.mxu3  ;;  %v786_v60 = vpop.f32.mrf.mxu2 }
 0x298   :  { %v812_v13 = vadd.f32 %v809_v12, %v791_v11  ;;  %v789_v6 = vadd.f32 %v786_v60, %v768_v62  ;;  %v2230_v11 = vld [vmem:[#allocation7 + $0x30] sm:$0xff]  ;;  %v2257_v60 = vld [vmem:[#allocation7 + $0x40] sm:$0xff]  ;;  %v78_v62 = vpop.permute.xlu2 %77 }
 0x299   :  { %v2233_v12 = vld [vmem:[#allocation7 + $0x50] sm:$0xff]  ;;  %v204_v19 = vmul.f32 %v2027_v25, %v78_v62 }
 0x29a   :  { %v1591_v14 = vmul.f32 -1.442695, %v812_v13  ;;  %v2236_v13 = vld [vmem:[#allocation7 + $0x70] sm:$0xff] }
 0x29b   :  { %v1689_v15 = vpop.eup %1688 }
 0x29c   :  { %v1691_v16 = vpop.eup %1690  ;;  %v816_v46 = vadd.f32 1.0, %v1689_v15  ;;  %1692 = vpow2.f32 %v1591_v14  ;;  %v2239_v14 = vld [vmem:[#allocation7 + $0x8] sm:$0xff] }
 0x29d   :  { %v835_v17 = vadd.f32 1.0, %v1691_v16  ;;  %v2242_v15 = vld [vmem:[#allocation7 + $0x28] sm:$0xff] }
 0x29e   :  { %1694 = vrcp.f32 %v816_v46  ;;  %v828_v33 = vand.u32 2147483648, %v816_v46  ;;  %v826_v36 = vand.u32 2147483647, %v816_v46  ;;  %vm822_vm9 = vweird.f32 %v816_v46  ;;  %v2245_v16 = vld [vmem:[#allocation7 + $0x48] sm:$0xff] }
 0x29f   :  { %1696 = vrcp.f32 %v835_v17  ;;  %v847_v34 = vand.u32 2147483648, %v835_v17  ;;  %v845_v38 = vand.u32 2147483647, %v835_v17  ;;  %vm841_vm10 = vweird.f32 %v835_v17 }
 0x2a0   :  { %v829_v41 = vor.u32 1.1754944e-38, %v828_v33  ;;  %vm827_vm13 = vcmp.eq.f32.partialorder %v826_v36, 8.507059e+37 }
 0x2a1   :  { %v848_v44 = vor.u32 1.1754944e-38, %v847_v34  ;;  %vm846_vm14 = vcmp.eq.f32.partialorder %v845_v38, 8.507059e+37 }
 0x2a2   :  { %v1693_v61 = vpop.eup %1692 }
 0x2a3   :  { %v855_v63 = vadd.f32 1.0, %v1693_v61  ;;  %v2260_v61 = vld [vmem:[#allocation7 + $0x60] sm:$0xff] }
 0x2a4   :  { %v1695_v0 = vpop.eup %1694 }
 0x2a5   :  { %v1697_v20 = vpop.eup %1696  ;;  %v818_v21 = vmul.f32 %v1695_v0, %v816_v46  ;;  %1698 = vrcp.f32 %v855_v63  ;;  %vm823_vm7 = vweird.f32 %v1695_v0  ;;  %v867_v57 = vand.u32 2147483648, %v855_v63  ;;  %v2248_v46 = vld [vmem:[#allocation7 + $0x68] sm:$0xff] }
 0x2a6   :  { %v837_v30 = vmul.f32 %v1697_v20, %v835_v17  ;;  %1700 = vtanh.f32 %v789_v6  ;;  %vm842_vm8 = vweird.f32 %v1697_v20  ;;  %vm824_vm11 = vmor %vm822_vm9, %vm823_vm7  ;;  %vm861_vm1 = vweird.f32 %v855_v63  ;;  %v2251_v17 = vld [vmem:[#allocation7] sm:$0xff] }
 0x2a7   :  { %v819_v31 = vsub.f32 1.0, %v818_v21  ;;  %vm843_vm12 = vmor %vm841_vm10, %vm842_vm8  ;;  %v865_v58 = vand.u32 2147483647, %v855_v63  ;;  %v868_v2 = vor.u32 1.1754944e-38, %v867_v57  ;;  %v170_v6 = vmul.f32 %v2022_v24, %v78_v62 }
 0x2a8   :  { %v838_v32 = vsub.f32 1.0, %v837_v30 }
 0x2a9   :  { %v820_v35 = vmul.f32 %v1695_v0, %v819_v31  ;;  %vm866_vm3 = vcmp.eq.f32.partialorder %v865_v58, 8.507059e+37  ;;  %v183_v30 = vadd.f32 %v2042_v28, %v170_v6  ;;  %v217_v31 = vadd.f32 %v2047_v29, %v204_v19 }
 0x2aa   :  { %v839_v37 = vmul.f32 %v1697_v20, %v838_v32  ;;  %v83_v32 = vpop.permute.xlu2 %82 }
 0x2ab   :  { %v1699_v39 = vpop.eup %1698  ;;  %v821_v40 = vadd.f32 %v1695_v0, %v820_v35  ;;  %191 = vst.msk [vmem:[#allocation4 + $0x20] sm:$0xff] %vm118_vm0, %v183_v30  ;;  %v103_v33 = vmul.f32 %v2012_v22, %v83_v32  ;;  %v137_v34 = vmul.f32 %v2017_v23, %v83_v32  ;;  %v171_v35 = vmul.f32 %v2022_v24, %v83_v32 }
 0x2ac   :  { %v840_v42 = vadd.f32 %v1697_v20, %v839_v37  ;;  %v857_v43 = vmul.f32 %v1699_v39, %v855_v63  ;;  %v1701_v47 = vpop.eup %1700  ;;  %vm862_vm15 = vweird.f32 %v1699_v39  ;;  %v102_v63 = vmul.f32 %v2012_v22, %v78_v62  ;;  %225 = vst.msk [vmem:[#allocation5 + $0x20] sm:$0xff] %vm118_vm0, %v217_v31 }
 0x2ad   :  { %v825_v45 = vsel %vm824_vm11, %v1695_v0, %v821_v40  ;;  %vm863_vm2 = vmor %vm861_vm1, %vm862_vm15  ;;  %v136_v0 = vmul.f32 %v2017_v23, %v78_v62  ;;  %v205_v36 = vmul.f32 %v2027_v25, %v83_v32  ;;  %v115_v37 = vadd.f32 %v2032_v26, %v103_v33 }
 0x2ae   :  { %v830_v48 = vsel %vm827_vm13, %v829_v41, %v825_v45  ;;  %v844_v49 = vsel %vm843_vm12, %v1697_v20, %v840_v42  ;;  %v858_v50 = vsub.f32 1.0, %v857_v43  ;;  %v114_v20 = vadd.f32 %v2032_v26, %v102_v63 }
 0x2af   :  { %v849_v51 = vsel %vm846_vm14, %v848_v44, %v844_v49  ;;  %v872_v53 = vmul.f32 %v1701_v47, %v830_v48  ;;  %v149_v21 = vadd.f32 %v2037_v27, %v136_v0  ;;  %v150_v38 = vadd.f32 %v2037_v27, %v137_v34  ;;  %124 = vst.msk [vmem:[#allocation2 + $0x28] sm:$0xff] %vm118_vm0, %v115_v37 }
 0x2b0   :  { %v871_v54 = vmul.f32 %v849_v51, %v2178_v52  ;;  %v859_v1 = vmul.f32 %v1699_v39, %v858_v50  ;;  %v2215_v52 = vld [vmem:[#allocation7 + $0x18] sm:$0xff]  ;;  %123 = vst.msk [vmem:[#allocation2 + $0x20] sm:$0xff] %vm118_vm0, %v114_v20  ;;  %v218_v40 = vadd.f32 %v2047_v29, %v205_v36 }
 0x2b1   :  { %157 = vst.msk [vmem:[#allocation3 + $0x20] sm:$0xff] %vm118_vm0, %v149_v21 }
 0x2b2   :  { %v2208_v55 = vadd.f32 %v872_v53, %v871_v54  ;;  %v860_v56 = vadd.f32 %v1699_v39, %v859_v1  ;;  %158 = vst.msk [vmem:[#allocation3 + $0x28] sm:$0xff] %vm118_vm0, %v150_v38  ;;  %v926_v53 = vld [vmem:[#allocation4 + $0x20] sm:$0xff] }
 0x2b3   :  { %226 = vst.msk [vmem:[#allocation5 + $0x28] sm:$0xff] %vm118_vm0, %v218_v40 }
 0x2b4   :  { %1702 = vtanh.f32 %v2208_v55  ;;  %v864_v59 = vsel %vm863_vm2, %v1699_v39, %v860_v56  ;;  %v184_v39 = vadd.f32 %v2042_v28, %v171_v35  ;;  %v949_v28 = vld [vmem:[#allocation5 + $0x20] sm:$0xff] }
 0x2b5   :  { %v869_v4 = vsel %vm866_vm3, %v868_v2, %v864_v59 }
 0x2b6   :  { %192 = vst.msk [vmem:[#allocation4 + $0x28] sm:$0xff] %vm118_vm0, %v184_v39 }
 0x2b7   :  { %v877_v22 = vld [vmem:[#allocation2 + $0x20] sm:$0xff] }
 0x2b8   :  { %v903_v23 = vld [vmem:[#allocation3 + $0x20] sm:$0xff] }
 0x2ba   :  { %v1703_v3 = vpop.eup %1702 }
 0x2bb   :  { %v875_v5 = vmul.f32 %v1703_v3, %v869_v4 }
 0x2bd   :  { %1592 = vmatmul.msk.f32.vlgmr.msra.gmra.mxu0 %vm118_vm0, %v875_v5  ;;  %1593 = vmatmul.msk.f32.vlgmr.msra.gmra.mxu1 %vm118_vm0, %v875_v5 }
 0x2be   :  { %1594 = vmatmul.msk.f32.vlgmr.msra.gmra.mxu2 %vm118_vm0, %v875_v5  ;;  %1595 = vmatmul.msk.f32.vlgmr.msra.gmra.mxu3 %vm118_vm0, %v875_v5 }
 0x2bf   :  { %1209 = vmatpush.msra.mxu0 %v2215_v52  ;;  %1232 = vmatpush.msra.mxu1 %v2218_v7 }
 0x2c0   :  { %1255 = vmatpush.msra.mxu2 %v2221_v8  ;;  %1278 = vmatpush.msra.mxu3 %v2224_v9 }
 0x2c1   :  { %1210 = vmatpush.msra.mxu0 %v2227_v10  ;;  %1233 = vmatpush.msra.mxu1 %v2230_v11 }
 0x2c2   :  { %1256 = vmatpush.msra.mxu2 %v2233_v12  ;;  %1279 = vmatpush.msra.mxu3 %v2236_v13 }
 0x2c3   :  { %1211 = vmatpush.msra.mxu0 %v2239_v14  ;;  %1234 = vmatpush.msra.mxu1 %v2242_v15 }
 0x2c4   :  { %1257 = vmatpush.msra.mxu2 %v2245_v16  ;;  %1280 = vmatpush.msra.mxu3 %v2248_v46 }
 0x2c5   :  { %1212 = vmatpush.msra.mxu0 %v2251_v17  ;;  %1235 = vmatpush.msra.mxu1 %v2254_v18 }
 0x2c6   :  { %1258 = vmatpush.msra.mxu2 %v2257_v60  ;;  %1281 = vmatpush.msra.mxu3 %v2260_v61 }
 0x33a   :  { %v898_v24 = vpop.f32.mrf.mxu0  ;;  %v921_v25 = vpop.f32.mrf.mxu1 }
 0x33b   :  { %v901_v41 = vadd.f32 %v898_v24, %v877_v22  ;;  %v924_v26 = vadd.f32 %v921_v25, %v903_v23 }
 0x33d   :  { %v1596_v42 = vmul.f32 -1.442695, %v901_v41  ;;  %v1597_v27 = vmul.f32 -1.442695, %v924_v26 }
 0x33f   :  { %1704 = vpow2.f32 %v1596_v42 }
 0x340   :  { %1706 = vpow2.f32 %v1597_v27 }
 0x341   :  { %v967_v29 = vpop.f32.mrf.mxu3  ;;  %v944_v50 = vpop.f32.mrf.mxu2 }
 0x342   :  { %v970_v43 = vadd.f32 %v967_v29, %v949_v28  ;;  %v947_v56 = vadd.f32 %v944_v50, %v926_v53 }
 0x344   :  { %v1598_v44 = vmul.f32 -1.442695, %v970_v43 }
 0x345   :  { %v1705_v45 = vpop.eup %1704 }
 0x346   :  { %v1707_v47 = vpop.eup %1706  ;;  %v974_v48 = vadd.f32 1.0, %v1705_v45  ;;  %1708 = vpow2.f32 %v1598_v44  ;;  %v1084_v44 = vld [vmem:[#allocation4 + $0x28] sm:$0xff] }
 0x347   :  { %v993_v49 = vadd.f32 1.0, %v1707_v47 }
 0x348   :  { %1710 = vrcp.f32 %v974_v48  ;;  %v986_v4 = vand.u32 2147483648, %v974_v48  ;;  %v984_v63 = vand.u32 2147483647, %v974_v48  ;;  %vm980_vm6 = vweird.f32 %v974_v48 }
 0x349   :  { %1712 = vrcp.f32 %v993_v49  ;;  %v1005_v5 = vand.u32 2147483648, %v993_v49  ;;  %v1003_v6 = vand.u32 2147483647, %v993_v49  ;;  %vm999_vm7 = vweird.f32 %v993_v49 }
 0x34a   :  { %v987_v21 = vor.u32 1.1754944e-38, %v986_v4  ;;  %vm985_vm10 = vcmp.eq.f32.partialorder %v984_v63, 8.507059e+37 }
 0x34b   :  { %v1006_v32 = vor.u32 1.1754944e-38, %v1005_v5  ;;  %vm1004_vm11 = vcmp.eq.f32.partialorder %v1003_v6, 8.507059e+37 }
 0x34c   :  { %v1709_v51 = vpop.eup %1708 }
 0x34d   :  { %v1013_v54 = vadd.f32 1.0, %v1709_v51 }
 0x34e   :  { %v1711_v1 = vpop.eup %1710 }
 0x34f   :  { %v1713_v57 = vpop.eup %1712  ;;  %v976_v58 = vmul.f32 %v1711_v1, %v974_v48  ;;  %1714 = vrcp.f32 %v1013_v54  ;;  %vm981_vm4 = vweird.f32 %v1711_v1  ;;  %v1025_v25 = vand.u32 2147483648, %v1013_v54 }
 0x350   :  { %v995_v59 = vmul.f32 %v1713_v57, %v993_v49  ;;  %1716 = vtanh.f32 %v947_v56  ;;  %vm1000_vm5 = vweird.f32 %v1713_v57  ;;  %vm982_vm8 = vmor %vm980_vm6, %vm981_vm4  ;;  %vm1019_vm13 = vweird.f32 %v1013_v54 }
 0x351   :  { %v977_v2 = vsub.f32 1.0, %v976_v58  ;;  %vm1001_vm9 = vmor %vm999_vm7, %vm1000_vm5  ;;  %v1023_v41 = vand.u32 2147483647, %v1013_v54  ;;  %v1026_v42 = vor.u32 1.1754944e-38, %v1025_v25 }
 0x352   :  { %v996_v3 = vsub.f32 1.0, %v995_v59 }
 0x353   :  { %v978_v62 = vmul.f32 %v1711_v1, %v977_v2  ;;  %vm1024_vm15 = vcmp.eq.f32.partialorder %v1023_v41, 8.507059e+37 }
 0x354   :  { %v997_v0 = vmul.f32 %v1713_v57, %v996_v3 }
 0x355   :  { %v1715_v19 = vpop.eup %1714  ;;  %v979_v20 = vadd.f32 %v1711_v1, %v978_v62 }
 0x356   :  { %v998_v30 = vadd.f32 %v1713_v57, %v997_v0  ;;  %v1015_v31 = vmul.f32 %v1715_v19, %v1013_v54  ;;  %v1717_v34 = vpop.eup %1716  ;;  %vm1020_vm12 = vweird.f32 %v1715_v19 }
 0x357   :  { %v983_v33 = vsel %vm982_vm8, %v1711_v1, %v979_v20  ;;  %vm1021_vm14 = vmor %vm1019_vm13, %vm1020_vm12 }
 0x358   :  { %v988_v35 = vsel %vm985_vm10, %v987_v21, %v983_v33  ;;  %v1002_v36 = vsel %vm1001_vm9, %v1713_v57, %v998_v30  ;;  %v1016_v37 = vsub.f32 1.0, %v1015_v31 }
 0x359   :  { %v1007_v38 = vsel %vm1004_vm11, %v1006_v32, %v1002_v36  ;;  %v1030_v39 = vmul.f32 %v1717_v34, %v988_v35 }
 0x35a   :  { %v1029_v40 = vmul.f32 %v1007_v38, %v2208_v55  ;;  %v1017_v22 = vmul.f32 %v1715_v19, %v1016_v37  ;;  %v1035_v55 = vld [vmem:[#allocation2 + $0x28] sm:$0xff] }
 0x35c   :  { %v2288_v23 = vadd.f32 %v1030_v39, %v1029_v40  ;;  %v1018_v24 = vadd.f32 %v1715_v19, %v1017_v22 }
 0x35e   :  { %1718 = vtanh.f32 %v2288_v23  ;;  %v1022_v26 = vsel %vm1021_vm14, %v1715_v19, %v1018_v24 }
 0x35f   :  { %v1027_v28 = vsel %vm1024_vm15, %v1026_v42, %v1022_v26  ;;  %v1219_v26 = vld [vmem:[#allocation3 + $0x30] sm:$0xff] }
 0x364   :  { %v1719_v27 = vpop.eup %1718 }
 0x365   :  { %v1033_v29 = vmul.f32 %v1719_v27, %v1027_v28 }
 0x367   :  { %1599 = vmatmul.msk.f32.vlgmr.msrb.gmra.mxu0 %vm118_vm0, %v1033_v29  ;;  %1600 = vmatmul.msk.f32.vlgmr.msrb.gmra.mxu1 %vm118_vm0, %v1033_v29 }
 0x368   :  { %1601 = vmatmul.msk.f32.vlgmr.msrb.gmra.mxu2 %vm118_vm0, %v1033_v29  ;;  %1602 = vmatmul.msk.f32.vlgmr.msrb.gmra.mxu3 %vm118_vm0, %v1033_v29 }
 0x369   :  { %1367 = vmatpush.msrb.mxu0 %v2215_v52  ;;  %1390 = vmatpush.msrb.mxu1 %v2218_v7  ;;  %v1061_v7 = vld [vmem:[#allocation3 + $0x28] sm:$0xff] }
 0x36a   :  { %1413 = vmatpush.msrb.mxu2 %v2221_v8  ;;  %1436 = vmatpush.msrb.mxu3 %v2224_v9 }
 0x36b   :  { %1368 = vmatpush.msrb.mxu0 %v2227_v10  ;;  %1391 = vmatpush.msrb.mxu1 %v2230_v11 }
 0x36c   :  { %1414 = vmatpush.msrb.mxu2 %v2233_v12  ;;  %1437 = vmatpush.msrb.mxu3 %v2236_v13  ;;  %v1107_v13 = vld [vmem:[#allocation5 + $0x28] sm:$0xff] }
 0x36d   :  { %1369 = vmatpush.msrb.mxu0 %v2239_v14  ;;  %1392 = vmatpush.msrb.mxu1 %v2242_v15 }
 0x36e   :  { %1415 = vmatpush.msrb.mxu2 %v2245_v16  ;;  %1438 = vmatpush.msrb.mxu3 %v2248_v46 }
 0x36f   :  { %1370 = vmatpush.msrb.mxu0 %v2251_v17  ;;  %1393 = vmatpush.msrb.mxu1 %v2254_v18 }
 0x370   :  { %1416 = vmatpush.msrb.mxu2 %v2257_v60  ;;  %1439 = vmatpush.msrb.mxu3 %v2260_v61 }
 0x3e4   :  { %v1056_v52 = vpop.f32.mrf.mxu0  ;;  %v1079_v8 = vpop.f32.mrf.mxu1 }
 0x3e5   :  { %v1059_v9 = vadd.f32 %v1056_v52, %v1035_v55  ;;  %v1082_v10 = vadd.f32 %v1079_v8, %v1061_v7  ;;  %v1265_v52 = vld [vmem:[#allocation5 + $0x30] sm:$0xff] }
 0x3e7   :  { %v1603_v11 = vmul.f32 -1.442695, %v1059_v9  ;;  %v1604_v12 = vmul.f32 -1.442695, %v1082_v10 }
 0x3e9   :  { %1720 = vpow2.f32 %v1603_v11 }
 0x3ea   :  { %1722 = vpow2.f32 %v1604_v12 }
 0x3eb   :  { %v1125_v14 = vpop.f32.mrf.mxu3  ;;  %v1102_v61 = vpop.f32.mrf.mxu2 }
 0x3ec   :  { %v1128_v15 = vadd.f32 %v1125_v14, %v1107_v13  ;;  %v1105_v48 = vadd.f32 %v1102_v61, %v1084_v44 }
 0x3ee   :  { %v1605_v16 = vmul.f32 -1.442695, %v1128_v15 }
 0x3ef   :  { %v1721_v46 = vpop.eup %1720 }
 0x3f0   :  { %v1723_v17 = vpop.eup %1722  ;;  %v1132_v18 = vadd.f32 1.0, %v1721_v46  ;;  %1724 = vpow2.f32 %v1605_v16  ;;  %v1242_v16 = vld [vmem:[#allocation4 + $0x30] sm:$0xff] }
 0x3f1   :  { %v1151_v60 = vadd.f32 1.0, %v1723_v17 }
 0x3f2   :  { %1726 = vrcp.f32 %v1132_v18  ;;  %v1144_v1 = vand.u32 2147483648, %v1132_v18  ;;  %v1142_v58 = vand.u32 2147483647, %v1132_v18  ;;  %vm1138_vm3 = vweird.f32 %v1132_v18 }
 0x3f3   :  { %1728 = vrcp.f32 %v1151_v60  ;;  %v1163_v56 = vand.u32 2147483648, %v1151_v60  ;;  %v1161_v2 = vand.u32 2147483647, %v1151_v60  ;;  %vm1157_vm4 = vweird.f32 %v1151_v60 }
 0x3f4   :  { %v1145_v5 = vor.u32 1.1754944e-38, %v1144_v1  ;;  %vm1143_vm7 = vcmp.eq.f32.partialorder %v1142_v58, 8.507059e+37 }
 0x3f5   :  { %v1164_v0 = vor.u32 1.1754944e-38, %v1163_v56  ;;  %vm1162_vm8 = vcmp.eq.f32.partialorder %v1161_v2, 8.507059e+37 }
 0x3f6   :  { %v1725_v43 = vpop.eup %1724 }
 0x3f7   :  { %v1171_v45 = vadd.f32 1.0, %v1725_v43 }
 0x3f8   :  { %v1727_v47 = vpop.eup %1726 }
 0x3f9   :  { %v1729_v49 = vpop.eup %1728  ;;  %v1134_v50 = vmul.f32 %v1727_v47, %v1132_v18  ;;  %1730 = vrcp.f32 %v1171_v45  ;;  %vm1139_vm1 = vweird.f32 %v1727_v47  ;;  %v1183_v37 = vand.u32 2147483648, %v1171_v45 }
 0x3fa   :  { %v1153_v51 = vmul.f32 %v1729_v49, %v1151_v60  ;;  %1732 = vtanh.f32 %v1105_v48  ;;  %vm1158_vm2 = vweird.f32 %v1729_v49  ;;  %vm1140_vm5 = vmor %vm1138_vm3, %vm1139_vm1  ;;  %vm1177_vm10 = vweird.f32 %v1171_v45 }
 0x3fb   :  { %v1135_v53 = vsub.f32 1.0, %v1134_v50  ;;  %vm1159_vm6 = vmor %vm1157_vm4, %vm1158_vm2  ;;  %v1181_v38 = vand.u32 2147483647, %v1171_v45  ;;  %v1184_v40 = vor.u32 1.1754944e-38, %v1183_v37 }
 0x3fc   :  { %v1154_v54 = vsub.f32 1.0, %v1153_v51 }
 0x3fd   :  { %v1136_v57 = vmul.f32 %v1727_v47, %v1135_v53  ;;  %vm1182_vm12 = vcmp.eq.f32.partialorder %v1181_v38, 8.507059e+37 }
 0x3fe   :  { %v1155_v59 = vmul.f32 %v1729_v49, %v1154_v54 }
 0x3ff   :  { %v1731_v3 = vpop.eup %1730  ;;  %v1137_v4 = vadd.f32 %v1727_v47, %v1136_v57 }
 0x400   :  { %v1156_v62 = vadd.f32 %v1729_v49, %v1155_v59  ;;  %v1173_v63 = vmul.f32 %v1731_v3, %v1171_v45  ;;  %v1733_v19 = vpop.eup %1732  ;;  %vm1178_vm9 = vweird.f32 %v1731_v3 }
 0x401   :  { %v1141_v6 = vsel %vm1140_vm5, %v1727_v47, %v1137_v4  ;;  %vm1179_vm11 = vmor %vm1177_vm10, %vm1178_vm9 }
 0x402   :  { %v1146_v20 = vsel %vm1143_vm7, %v1145_v5, %v1141_v6  ;;  %v1160_v21 = vsel %vm1159_vm6, %v1729_v49, %v1156_v62  ;;  %v1174_v30 = vsub.f32 1.0, %v1173_v63 }
 0x403   :  { %v1165_v31 = vsel %vm1162_vm8, %v1164_v0, %v1160_v21  ;;  %v1188_v32 = vmul.f32 %v1733_v19, %v1146_v20 }
 0x404   :  { %v1187_v33 = vmul.f32 %v1165_v31, %v2288_v23  ;;  %v1175_v34 = vmul.f32 %v1731_v3, %v1174_v30  ;;  %v1193_v23 = vld [vmem:[#allocation2 + $0x30] sm:$0xff] }
 0x406   :  { %v2312_v35 = vadd.f32 %v1188_v32, %v1187_v33  ;;  %v1176_v36 = vadd.f32 %v1731_v3, %v1175_v34 }
 0x408   :  { %1734 = vtanh.f32 %v2312_v35  ;;  %v1180_v39 = vsel %vm1179_vm11, %v1731_v3, %v1176_v36 }
 0x409   :  { %v1185_v24 = vsel %vm1182_vm12, %v1184_v40, %v1180_v39  ;;  %v1377_v39 = vld [vmem:[#allocation3 + $0x38] sm:$0xff] }
 0x40e   :  { %v1735_v22 = vpop.eup %1734 }
 0x40f   :  { %v1191_v25 = vmul.f32 %v1735_v22, %v1185_v24 }
 0x411   :  { %1606 = vmatmul.msk.f32.vlgmr.msra.gmra.mxu0 %vm118_vm0, %v1191_v25  ;;  %1607 = vmatmul.msk.f32.vlgmr.msra.gmra.mxu1 %vm118_vm0, %v1191_v25 }
 0x412   :  { %1608 = vmatmul.msk.f32.vlgmr.msra.gmra.mxu2 %vm118_vm0, %v1191_v25  ;;  %1609 = vmatmul.msk.f32.vlgmr.msra.gmra.mxu3 %vm118_vm0, %v1191_v25 }
 0x48e   :  { %v1214_v41 = vpop.f32.mrf.mxu0  ;;  %v1237_v42 = vpop.f32.mrf.mxu1 }
 0x48f   :  { %v1217_v27 = vadd.f32 %v1214_v41, %v1193_v23  ;;  %v1240_v28 = vadd.f32 %v1237_v42, %v1219_v26  ;;  %v1423_v41 = vld [vmem:[#allocation5 + $0x38] sm:$0xff] }
 0x491   :  { %v1610_v29 = vmul.f32 -1.442695, %v1217_v27  ;;  %v1611_v55 = vmul.f32 -1.442695, %v1240_v28 }
 0x493   :  { %1736 = vpow2.f32 %v1610_v29 }
 0x494   :  { %1738 = vpow2.f32 %v1611_v55 }
 0x495   :  { %v1283_v7 = vpop.f32.mrf.mxu3  ;;  %v1260_v14 = vpop.f32.mrf.mxu2 }
 0x496   :  { %v1286_v8 = vadd.f32 %v1283_v7, %v1265_v52  ;;  %v1263_v18 = vadd.f32 %v1260_v14, %v1242_v16 }
 0x498   :  { %v1612_v9 = vmul.f32 -1.442695, %v1286_v8 }
 0x499   :  { %v1737_v10 = vpop.eup %1736 }
 0x49a   :  { %v1739_v11 = vpop.eup %1738  ;;  %v1290_v12 = vadd.f32 1.0, %v1737_v10  ;;  %1740 = vpow2.f32 %v1612_v9  ;;  %v1400_v9 = vld [vmem:[#allocation4 + $0x38] sm:$0xff] }
 0x49b   :  { %v1309_v13 = vadd.f32 1.0, %v1739_v11 }
 0x49c   :  { %1742 = vrcp.f32 %v1290_v12  ;;  %v1302_v47 = vand.u32 2147483648, %v1290_v12  ;;  %v1300_v50 = vand.u32 2147483647, %v1290_v12  ;;  %vm1296_vm15 = vweird.f32 %v1290_v12 }
 0x49d   :  { %1744 = vrcp.f32 %v1309_v13  ;;  %v1321_v48 = vand.u32 2147483648, %v1309_v13  ;;  %v1319_v53 = vand.u32 2147483647, %v1309_v13  ;;  %vm1315_vm1 = vweird.f32 %v1309_v13 }
 0x49e   :  { %v1303_v56 = vor.u32 1.1754944e-38, %v1302_v47  ;;  %vm1301_vm4 = vcmp.eq.f32.partialorder %v1300_v50, 8.507059e+37 }
 0x49f   :  { %v1322_v59 = vor.u32 1.1754944e-38, %v1321_v48  ;;  %vm1320_vm5 = vcmp.eq.f32.partialorder %v1319_v53, 8.507059e+37 }
 0x4a0   :  { %v1741_v15 = vpop.eup %1740 }
 0x4a1   :  { %v1329_v46 = vadd.f32 1.0, %v1741_v15 }
 0x4a2   :  { %v1743_v17 = vpop.eup %1742 }
 0x4a3   :  { %v1745_v60 = vpop.eup %1744  ;;  %v1292_v61 = vmul.f32 %v1743_v17, %v1290_v12  ;;  %1746 = vrcp.f32 %v1329_v46  ;;  %vm1297_vm13 = vweird.f32 %v1743_v17  ;;  %v1341_v30 = vand.u32 2147483648, %v1329_v46 }
 0x4a4   :  { %v1311_v43 = vmul.f32 %v1745_v60, %v1309_v13  ;;  %1748 = vtanh.f32 %v1263_v18  ;;  %vm1316_vm14 = vweird.f32 %v1745_v60  ;;  %vm1298_vm2 = vmor %vm1296_vm15, %vm1297_vm13  ;;  %vm1335_vm7 = vweird.f32 %v1329_v46 }
 0x4a5   :  { %v1293_v44 = vsub.f32 1.0, %v1292_v61  ;;  %vm1317_vm3 = vmor %vm1315_vm1, %vm1316_vm14  ;;  %v1339_v31 = vand.u32 2147483647, %v1329_v46  ;;  %v1342_v33 = vor.u32 1.1754944e-38, %v1341_v30 }
 0x4a6   :  { %v1312_v45 = vsub.f32 1.0, %v1311_v43 }
 0x4a7   :  { %v1294_v49 = vmul.f32 %v1743_v17, %v1293_v44  ;;  %vm1340_vm9 = vcmp.eq.f32.partialorder %v1339_v31, 8.507059e+37 }
 0x4a8   :  { %v1313_v51 = vmul.f32 %v1745_v60, %v1312_v45 }
 0x4a9   :  { %v1747_v54 = vpop.eup %1746  ;;  %v1295_v1 = vadd.f32 %v1743_v17, %v1294_v49 }
 0x4aa   :  { %v1314_v57 = vadd.f32 %v1745_v60, %v1313_v51  ;;  %v1331_v58 = vmul.f32 %v1747_v54, %v1329_v46  ;;  %v1749_v3 = vpop.eup %1748  ;;  %vm1336_vm6 = vweird.f32 %v1747_v54 }
 0x4ab   :  { %v1299_v2 = vsel %vm1298_vm2, %v1743_v17, %v1295_v1  ;;  %vm1337_vm8 = vmor %vm1335_vm7, %vm1336_vm6  ;;  %vm1523_vm7 = vcmask 7168  }
 0x4ac   :  { %v1304_v4 = vsel %vm1301_vm4, %v1303_v56, %v1299_v2  ;;  %v1318_v5 = vsel %vm1317_vm3, %v1745_v60, %v1314_v57  ;;  %v1332_v62 = vsub.f32 1.0, %v1331_v58 }
 0x4ad   :  { %v1323_v63 = vsel %vm1320_vm5, %v1322_v59, %v1318_v5  ;;  %v1346_v0 = vmul.f32 %v1749_v3, %v1304_v4 }
 0x4ae   :  { %v1345_v6 = vmul.f32 %v1323_v63, %v2312_v35  ;;  %v1333_v19 = vmul.f32 %v1747_v54, %v1332_v62  ;;  %v1351_v35 = vld [vmem:[#allocation2 + $0x38] sm:$0xff] }
 0x4b0   :  { %v2320_v20 = vadd.f32 %v1346_v0, %v1345_v6  ;;  %v1334_v21 = vadd.f32 %v1747_v54, %v1333_v19 }
 0x4b2   :  { %1750 = vtanh.f32 %v2320_v20  ;;  %v1338_v32 = vsel %vm1337_vm8, %v1747_v54, %v1334_v21 }
 0x4b3   :  { %v1343_v36 = vsel %vm1340_vm9, %v1342_v33, %v1338_v32 }
 0x4b8   :  { %v1751_v34 = vpop.eup %1750 }
 0x4b9   :  { %v1349_v37 = vmul.f32 %v1751_v34, %v1343_v36  ;;  %v1639_v34 = vld [vmem:[#allocation6] ss:$0 sm:$0xff] }
 0x4bb   :  { %1613 = vmatmul.msk.f32.vlgmr.msrb.gmra.mxu0 %vm118_vm0, %v1349_v37  ;;  %1614 = vmatmul.msk.f32.vlgmr.msrb.gmra.mxu1 %vm118_vm0, %v1349_v37 }
 0x4bc   :  { %1615 = vmatmul.msk.f32.vlgmr.msrb.gmra.mxu2 %vm118_vm0, %v1349_v37  ;;  %1616 = vmatmul.msk.f32.vlgmr.msrb.gmra.mxu3 %vm118_vm0, %v1349_v37 }
 0x538   :  { %v1372_v38 = vpop.f32.mrf.mxu0  ;;  %v1395_v40 = vpop.f32.mrf.mxu1 }
 0x539   :  { %v1375_v22 = vadd.f32 %v1372_v38, %v1351_v35  ;;  %v1398_v24 = vadd.f32 %v1395_v40, %v1377_v39 }
 0x53b   :  { %v1617_v25 = vmul.f32 -1.442695, %v1375_v22  ;;  %v1618_v23 = vmul.f32 -1.442695, %v1398_v24 }
 0x53d   :  { %1752 = vpow2.f32 %v1617_v25 }
 0x53e   :  { %1754 = vpow2.f32 %v1618_v23 }
 0x53f   :  { %v1441_v26 = vpop.f32.mrf.mxu3  ;;  %v1418_v7 = vpop.f32.mrf.mxu2 }
 0x540   :  { %v1444_v42 = vadd.f32 %v1441_v26, %v1423_v41  ;;  %v1421_v12 = vadd.f32 %v1418_v7, %v1400_v9 }
 0x542   :  { %v1619_v27 = vmul.f32 -1.442695, %v1444_v42 }
 0x543   :  { %v1753_v28 = vpop.eup %1752 }
 0x544   :  { %v1755_v29 = vpop.eup %1754  ;;  %v1448_v55 = vadd.f32 1.0, %v1753_v28  ;;  %1756 = vpow2.f32 %v1619_v27 }
 0x545   :  { %v1467_v52 = vadd.f32 1.0, %v1755_v29 }
 0x546   :  { %1758 = vrcp.f32 %v1448_v55  ;;  %v1460_v17 = vand.u32 2147483648, %v1448_v55  ;;  %v1458_v61 = vand.u32 2147483647, %v1448_v55  ;;  %vm1454_vm12 = vweird.f32 %v1448_v55 }
 0x547   :  { %1760 = vrcp.f32 %v1467_v52  ;;  %v1479_v18 = vand.u32 2147483648, %v1467_v52  ;;  %v1477_v44 = vand.u32 2147483647, %v1467_v52  ;;  %vm1473_vm13 = vweird.f32 %v1467_v52 }
 0x548   :  { %v1461_v48 = vor.u32 1.1754944e-38, %v1460_v17  ;;  %vm1459_vm1 = vcmp.eq.f32.partialorder %v1458_v61, 8.507059e+37 }
 0x549   :  { %v1480_v51 = vor.u32 1.1754944e-38, %v1479_v18  ;;  %vm1478_vm2 = vcmp.eq.f32.partialorder %v1477_v44, 8.507059e+37 }
 0x54a   :  { %v1757_v8 = vpop.eup %1756 }
 0x54b   :  { %v1487_v10 = vadd.f32 1.0, %v1757_v8 }
 0x54c   :  { %v1759_v11 = vpop.eup %1758 }
 0x54d   :  { %v1761_v13 = vpop.eup %1760  ;;  %v1450_v14 = vmul.f32 %v1759_v11, %v1448_v55  ;;  %1762 = vrcp.f32 %v1487_v10  ;;  %vm1455_vm10 = vweird.f32 %v1759_v11  ;;  %v1499_v62 = vand.u32 2147483648, %v1487_v10 }
 0x54e   :  { %v1469_v15 = vmul.f32 %v1761_v13, %v1467_v52  ;;  %1764 = vtanh.f32 %v1421_v12  ;;  %vm1474_vm11 = vweird.f32 %v1761_v13  ;;  %vm1456_vm14 = vmor %vm1454_vm12, %vm1455_vm10  ;;  %vm1493_vm4 = vweird.f32 %v1487_v10 }
 0x54f   :  { %v1451_v16 = vsub.f32 1.0, %v1450_v14  ;;  %vm1475_vm15 = vmor %vm1473_vm13, %vm1474_vm11  ;;  %v1497_v63 = vand.u32 2147483647, %v1487_v10  ;;  %v1500_v19 = vor.u32 1.1754944e-38, %v1499_v62 }
 0x550   :  { %v1470_v46 = vsub.f32 1.0, %v1469_v15 }
 0x551   :  { %v1452_v60 = vmul.f32 %v1759_v11, %v1451_v16  ;;  %vm1498_vm6 = vcmp.eq.f32.partialorder %v1497_v63, 8.507059e+37 }
 0x552   :  { %v1471_v43 = vmul.f32 %v1761_v13, %v1470_v46 }
 0x553   :  { %v1763_v45 = vpop.eup %1762  ;;  %v1453_v47 = vadd.f32 %v1759_v11, %v1452_v60 }
 0x554   :  { %v1472_v49 = vadd.f32 %v1761_v13, %v1471_v43  ;;  %v1489_v50 = vmul.f32 %v1763_v45, %v1487_v10  ;;  %v1765_v54 = vpop.eup %1764  ;;  %vm1494_vm3 = vweird.f32 %v1763_v45 }
 0x555   :  { %v1457_v53 = vsel %vm1456_vm14, %v1759_v11, %v1453_v47  ;;  %vm2329_vm5 = vmor %vm1493_vm4, %vm1494_vm3 }
 0x556   :  { %v1462_v1 = vsel %vm1459_vm1, %v1461_v48, %v1457_v53  ;;  %v1476_v56 = vsel %vm1475_vm15, %v1761_v13, %v1472_v49  ;;  %v1490_v57 = vsub.f32 1.0, %v1489_v50 }
 0x557   :  { %v1481_v58 = vsel %vm1478_vm2, %v1480_v51, %v1476_v56  ;;  %v1504_v59 = vmul.f32 %v1765_v54, %v1462_v1 }
 0x558   :  { %v1503_v2 = vmul.f32 %v1481_v58, %v2320_v20  ;;  %v1491_v3 = vmul.f32 %v1763_v45, %v1490_v57  ;;  %v1638_v20 = vld [vmem:[%s2353_s4] ss:$0 sm:$0xff] }
 0x55a   :  { %v1505_v4 = vadd.f32 %v1504_v59, %v1503_v2  ;;  %v1492_v5 = vadd.f32 %v1763_v45, %v1491_v3 }
 0x55c   :  { %1509 = vst.msk [vmem:[#allocation11] sm:$0xff] %vm118_vm0, %v1505_v4  ;;  %1766 = vtanh.f32 %v1505_v4  ;;  %v1496_v6 = vsel %vm2329_vm5, %v1763_v45, %v1492_v5 }
 0x55d   :  { %1548 = dma.vmem_to_hbm [thread:$0]  %s1544_s23, 128, %s1546_s26, [#allocation12]   ;;  %v1501_v30 = vsel %vm1498_vm6, %v1500_v19, %v1496_v6 }
 0x562   :  { %v1767_v21 = vpop.eup %1766 }
 0x563   :  { %v1507_v31 = vmul.f32 %v1767_v21, %v1501_v30 }
 0x565   :  { %v1514_v32 = vmul.f32 %v1638_v20, %v1507_v31  ;;  %1508 = vst.msk [vmem:[#allocation10] sm:$0xff] %vm118_vm0, %v1507_v31 }
 0x566   :  { %1537 = dma.vmem_to_hbm [thread:$0]  %s1533_s18, 128, %s1535_s21, [#allocation9]  }
 0x567   :  { %v1515_v33 = vsel %vm118_vm0, %v1514_v32, 0.0 }
 0x568   :  { %1516 = vadd.xlane.f32.xlu2 %v1515_v33 }
 0x5db   :  { %v1517_v36 = vpop.xlane.xlu2 %1516 }
 0x5dc   :  { %v1522_v37 = vadd.f32 %v1639_v34, %v1517_v36 }
 0x5de   :  { %1524 = vst.msk [vmem:[%s2355_s6] sm:$0xff] %vm1523_vm7, %v1522_v37 }
 0x5df   :  { %1858 = dma.done.wait [#allocation9], 128  }
 0x5e0   :  { %1859 = vsyncadd [#allocation9], 4294967168 }
 0x5e1   :  { %1860 = dma.done.wait [#allocation12], 128  }
 0x5e2   :  { %1861 = vsyncadd [#allocation12], 4294967168 }
 0x5e3   :  { %1559 = vsyncpa [#allocation8], 1 }
 0x5e4   :  { %1560 = vsyncpa [#allocation9], 1 }
 0x5e5   :  { %1561 = vsyncpa [#allocation12], 1 }

</bundles_post_ra>
